<compile_context>
chip_gen: v6e
topology: v6e:2x2x1
jax: 0.10.0
libtpu: 0.0.40
codegen_flags: <defaults>
</compile_context>

<pallas_src>
import functools

import jax
import jax.numpy as jnp
from jax.experimental import pallas as pl
from jax.experimental.pallas import tpu as pltpu


def _point_sim_kernel(vp_i_ref, vp_t_ref, ep_last_ref,
                      w1t_ref, b1_ref, w2t_ref, b2_ref, w3_ref, b3_ref,
                      ep_out_ref, node_out_ref, *, distance_metric, matmul_dtype):
    f32 = jnp.float32
    it = pl.program_id(1)

    v_i = vp_i_ref[0]                       # (TN, C)  row tile (index i)
    v_t = vp_t_ref[0]                       # (C, N)   all rows, pair axis j in lanes
    TN, C = v_i.shape
    N = v_t.shape[1]
    H1 = w1t_ref.shape[0]
    H2 = w2t_ref.shape[0]

    w1t = w1t_ref[...]                      # (H1, C), BN folded
    b1 = b1_ref[...]                        # (1, H1)

    if distance_metric == "l2":
        # Gram decomposition: ||vi-vj||^2 = |vi|^2 + |vj|^2 - 2 vi.vj, and conv1 is
        # linear in vp_sim, so the (TN, N, C) pairwise tensor is never materialized.
        gram = jnp.dot(v_i, v_t, preferred_element_type=f32)            # (TN, N)
        r_i = jnp.sum(v_i * v_i, axis=1, keepdims=True)                 # (TN, 1)
        r_j = jnp.sum(v_t * v_t, axis=0, keepdims=True)                 # (1, N)
        node_out_ref[0] = -(r_i + r_j - 2.0 * gram)                     # node_similarity_l2

        sq_i = v_i * v_i                                                # (TN, C)
        sq_t = v_t * v_t                                                # (C, N)
        a_i = jax.lax.dot_general(sq_i, w1t, (((1,), (1,)), ((), ())),
                                  preferred_element_type=f32)           # (TN, H1)
        a_j = jnp.dot(w1t, sq_t, preferred_element_type=f32)            # (H1, N)
        # cross term: -2 folded into the streamed operand; reshapes keep the lane dim.
        lhs = v_i[:, None, :] * (-2.0 * w1t)[None, :, :]                # (TN, H1, C)
        lhs = lhs.reshape(TN * H1, C).astype(matmul_dtype)
        cross = jnp.dot(lhs, v_t.astype(matmul_dtype),
                        preferred_element_type=f32)                     # (TN*H1, N)
        h = (a_i + b1)[:, :, None] + a_j[None, :, :] + cross.reshape(TN, H1, N)
    elif distance_metric == "l1":
        # Lane-dense pairwise tensor: j (size N) in the 128-lane dim.
        sim = jnp.abs(v_i[:, :, None] - v_t[None, :, :])                # (TN, C, N)
        node_out_ref[0] = -jnp.sum(sim, axis=1)
        w1t_b = jnp.broadcast_to(w1t.astype(matmul_dtype)[None], (TN, H1, C))
        h = jax.lax.dot_general(w1t_b, sim.astype(matmul_dtype),
                                (((2,), (1,)), ((0,), (0,))),
                                preferred_element_type=f32)             # (TN, H1, N)
        h = h + b1[:, :, None]
    else:
        raise ValueError(f"unsupported distance_metric: {distance_metric}")

    h = jnp.maximum(h, 0.01 * h)                                        # LeakyReLU(0.01)

    # conv2: batched over the TN rows so the pair axis j stays in the lane dim.
    w2t_b = jnp.broadcast_to(w2t_ref[...].astype(matmul_dtype)[None], (TN, H2, H1))
    h = jax.lax.dot_general(w2t_b, h.astype(matmul_dtype),
                            (((2,), (1,)), ((0,), (0,))),
                            preferred_element_type=f32)                 # (TN, H2, N)
    h = h + b2_ref[...][:, :, None]
    h = jnp.maximum(h, 0.01 * h)

    # conv3 (H2 -> 1): weighted accumulate over the H2 (sublane) axis at full lane width.
    logits = jnp.sum(h * w3_ref[...][:, :, None], axis=1) + b3_ref[...]  # (TN, N)
    ep = pl.reciprocal(1.0 + jnp.exp(-logits), approx=True)              # sigmoid via EUP

    # Edge renormalization epilogue; diagonal via iota (no eye() DMA'd in).
    ep_last = ep_last_ref[0]                                             # (TN, N)
    row_ids = jax.lax.broadcasted_iota(jnp.int32, (TN, N), 0) + it * TN
    col_ids = jax.lax.broadcasted_iota(jnp.int32, (TN, N), 1)
    diag = row_ids == col_ids

    ep_last_m = jnp.where(diag, 0.0, ep_last)                            # * (1 - I)
    row_sum = jnp.sum(ep_last_m, axis=-1, keepdims=True)                 # (TN, 1)
    prod = ep * ep_last_m
    l1_norm = jnp.maximum(jnp.sum(jnp.abs(prod), axis=-1, keepdims=True), 1e-12)
    out = prod * (row_sum * pl.reciprocal(l1_norm, approx=True))         # L1-normalize * rsum
    out = out + diag.astype(f32) + 1e-6
    out = out * pl.reciprocal(jnp.sum(out, axis=-1, keepdims=True), approx=True)
    ep_out_ref[0] = out


def _vmem_caps():
    """(tile-sizing budget, vmem_limit_bytes) derived from the chip's VMEM capacity."""
    try:
        cap = int(pltpu.get_tpu_info().vmem_capacity_bytes)
    except Exception:
        cap = 64 * 1024 * 1024                     # conservative (v7x per-core VMEM)
    budget = int(cap * 0.60)                       # leave room for double buffers / temps
    limit = min(int(cap * 0.85), 112 * 1024 * 1024)
    return budget, limit


def _choose_row_tile(N, C, H1, H2, *, l1_path, bf16, budget_bytes):
    """Largest TN (multiple of 8 dividing N) whose per-step working set fits VMEM."""
    def footprint(tn):
        f32b, b16b = 4, 2
        per_pair = H1 * f32b * 1.5 + H2 * f32b + 8 * f32b       # h1(+slack), h2, epilogue temps
        if bf16:
            per_pair += H1 * b16b                                # bf16 copy of h1 for conv2
        if l1_path:
            per_pair += C * (f32b + (b16b if bf16 else 0))       # |vi - vj| tensor
        body = per_pair * tn * N
        io = 2 * (tn * C + C * N + 3 * tn * N) * f32b            # double-buffered blocks
        scaled = tn * H1 * C * (f32b + (b16b if bf16 else 0))    # conv1 streamed operand
        return body + io + scaled + 64 * 1024                    # weights / misc slack
    cands = [t for t in range(8, N + 1, 8) if N % t == 0]
    if not cands:
        return N                                   # tiny / non-8-aligned N: one full tile
    for t in sorted(cands, reverse=True):
        if footprint(t) <= budget_bytes:
            return t
    # TODO(synk): for N so large that even TN=8 exceeds VMEM, add an inner j-chunk
    # ("arbitrary") grid axis with scratch accumulators for row_sum / l1.
    return cands[0]


def fold_point_sim_params(conv1_w, bn1, conv2_w, bn2, conv3_w, conv3_b, eps=1e-5):
    """Fold eval-mode BatchNorm into the bias-free 1x1 convs. Weights stay (out, in)
    so the kernel contracts over `in` without any in-kernel transpose."""
    def fold(w_oi, gamma, beta, mean, var):
        scale = gamma / jnp.sqrt(var + eps)
        w = (w_oi * scale[:, None]).astype(jnp.float32)              # (out, in)
        b = (beta - mean * scale).reshape(1, -1).astype(jnp.float32)  # (1, out)
        return w, b

    w1t, b1 = fold(conv1_w, *bn1)
    w2t, b2 = fold(conv2_w, *bn2)
    return dict(
        w1t=w1t, b1=b1, w2t=w2t, b2=b2,
        w3=jnp.reshape(conv3_w, (1, -1)).astype(jnp.float32),        # (1, H2)
        b3=jnp.reshape(conv3_b, (1, 1)).astype(jnp.float32),         # (1, 1)
    )


def point_similarity(vp_last_gen, ep_last_gen, params, distance_metric="l2",
                     matmul_dtype=jnp.bfloat16):
    """vp_last_gen: (B, N, C), ep_last_gen: (B, N, N).
    Returns (ep_ij (B, N, N), node_similarity_l2 (B, N, N)).
    Note: for tiny N (< 128) launch overhead + masked lane stores dominate and the
    plain-XLA path (point_similarity_ref) may be preferable."""
    B, N, C = vp_last_gen.shape
    assert ep_last_gen.shape == (B, N, N)
    if distance_metric not in ("l2", "l1"):
        raise ValueError(f"unsupported distance_metric: {distance_metric}")

    vp = vp_last_gen.astype(jnp.float32)
    ep_last = ep_last_gen.astype(jnp.float32)
    vp_t = jnp.transpose(vp, (0, 2, 1))           # (B, C, N): 'j' operand, N in lanes

    w1t, b1 = params["w1t"], params["b1"]
    w2t, b2 = params["w2t"], params["b2"]
    w3, b3 = params["w3"], params["b3"]
    H1, H2 = w1t.shape[0], w2t.shape[0]

    budget, vmem_limit = _vmem_caps()
    TN = _choose_row_tile(
        N, C, H1, H2,
        l1_path=(distance_metric == "l1"),
        bf16=(jnp.dtype(matmul_dtype) == jnp.dtype(jnp.bfloat16)),
        budget_bytes=budget)
    grid = (B, N // TN)

    kernel = functools.partial(_point_sim_kernel,
                               distance_metric=distance_metric,
                               matmul_dtype=matmul_dtype)

    return pl.pallas_call(
        kernel,
        out_shape=(jax.ShapeDtypeStruct((B, N, N), jnp.float32),
                   jax.ShapeDtypeStruct((B, N, N), jnp.float32)),
        grid_spec=pltpu.PrefetchScalarGridSpec(
            num_scalar_prefetch=0,
            grid=grid,
            in_specs=[
                pl.BlockSpec((1, TN, C), lambda b, i: (b, i, 0)),   # vp rows (i)
                pl.BlockSpec((1, C, N), lambda b, i: (b, 0, 0)),    # vp^T  (j, lane-dense)
                pl.BlockSpec((1, TN, N), lambda b, i: (b, i, 0)),   # ep_last tile
                pl.BlockSpec((H1, C), lambda b, i: (0, 0)),         # folded conv1 (out,in)
                pl.BlockSpec((1, H1), lambda b, i: (0, 0)),
                pl.BlockSpec((H2, H1), lambda b, i: (0, 0)),        # folded conv2 (out,in)
                pl.BlockSpec((1, H2), lambda b, i: (0, 0)),
                pl.BlockSpec((1, H2), lambda b, i: (0, 0)),         # conv3 weight
                pl.BlockSpec((1, 1), lambda b, i: (0, 0)),          # conv3 bias
            ],
            out_specs=(
                pl.BlockSpec((1, TN, N), lambda b, i: (b, i, 0)),
                pl.BlockSpec((1, TN, N), lambda b, i: (b, i, 0)),
            ),
        ),
        compiler_params=pltpu.CompilerParams(
            dimension_semantics=("parallel", "parallel"),
            vmem_limit_bytes=vmem_limit,
        ),
    )(vp, vp_t, ep_last, w1t, b1, w2t, b2, w3, b3)


def point_similarity_ref(vp, ep_last, params, distance_metric="l2"):
    """Pure-JAX reference mirroring the PyTorch forward (eval mode, BN folded)."""
    hp = jax.lax.Precision.HIGHEST
    diff = vp[:, :, None, :] - vp[:, None, :, :]
    sim = diff * diff if distance_metric == "l2" else jnp.abs(diff)
    x = jnp.einsum("bijc,hc->bijh", sim, params["w1t"], precision=hp) + params["b1"]
    x = jnp.maximum(x, 0.01 * x)
    x = jnp.einsum("bijh,kh->bijk", x, params["w2t"], precision=hp) + params["b2"]
    x = jnp.maximum(x, 0.01 * x)
    logits = jnp.einsum("bijk,k->bij", x, params["w3"][0], precision=hp) + params["b3"][0, 0]
    ep = jax.nn.sigmoid(logits)

    N = vp.shape[1]
    eye = jnp.eye(N, dtype=jnp.float32)
    ep_last_m = ep_last * (1.0 - eye)
    row_sum = jnp.sum(ep_last_m, axis=-1, keepdims=True)
    prod = ep * ep_last_m
    l1 = jnp.maximum(jnp.sum(jnp.abs(prod), axis=-1, keepdims=True), 1e-12)
    out = prod / l1 * row_sum
    out = out + eye + 1e-6
    out = out / jnp.sum(out, axis=-1, keepdims=True)
    node_sim = -jnp.sum(sim, axis=-1)
    return out, node_sim


if __name__ == "__main__":
    # Shapes implied by the module: batch=2, N=16 points, in_c=32, base_c=16.
    B, N = 2, 16
    in_c, base_c = 32, 16
    H1, H2 = 2 * base_c, base_c

    key = jax.random.PRNGKey(0)
    ks = jax.random.split(key, 14)

    vp = jax.random.normal(ks[0], (B, N, in_c), jnp.float32)
    ep_last = jax.random.uniform(ks[1], (B, N, N), jnp.float32)

    conv1_w = jax.random.normal(ks[2], (H1, in_c), jnp.float32) * (in_c ** -0.5)
    conv2_w = jax.random.normal(ks[3], (H2, H1), jnp.float32) * (H1 ** -0.5)
    conv3_w = jax.random.normal(ks[4], (1, H2), jnp.float32) * (H2 ** -0.5)
    conv3_b = jax.random.normal(ks[5], (1,), jnp.float32) * 0.1

    def make_bn(kg, kb, km, kv, n):
        return (1.0 + 0.1 * jax.random.normal(kg, (n,), jnp.float32),   # gamma
                0.1 * jax.random.normal(kb, (n,), jnp.float32),          # beta
                0.1 * jax.random.normal(km, (n,), jnp.float32),          # running_mean
                0.5 + jax.random.uniform(kv, (n,), jnp.float32))         # running_var

    bn1 = make_bn(ks[6], ks[7], ks[8], ks[9], H1)
    bn2 = make_bn(ks[10], ks[11], ks[12], ks[13], H2)

    # TODO(synk): training-mode Dropout2d / BatchNorm statistic updates are not
    # implemented; this is the eval-mode forward (dropout=0.0 default).
    params = fold_point_sim_params(conv1_w, bn1, conv2_w, bn2, conv3_w, conv3_b)

    ep_ref, node_ref = point_similarity_ref(vp, ep_last, params, "l2")

    # f32 MXU operands: checks the restructured (Gram-matrix) math.
    ep32, node32 = point_similarity(vp, ep_last, params, "l2", matmul_dtype=jnp.float32)
    jax.block_until_ready((ep32, node32))
    assert ep32.shape == (B, N, N) and node32.shape == (B, N, N)
    assert jnp.allclose(node32, node_ref, atol=2e-2, rtol=2e-3)
    assert jnp.allclose(ep32, ep_ref, atol=5e-3, rtol=5e-3)

    # bf16 MXU operands (production default): looser tolerance on the edge output.
    ep16, node16 = point_similarity(vp, ep_last, params, "l2")
    jax.block_until_ready((ep16, node16))
    assert jnp.allclose(node16, node_ref, atol=2e-2, rtol=2e-3)   # node path stays f32
    assert jnp.allclose(ep16, ep_ref, atol=2e-2, rtol=2e-2)

    # l1 distance metric path (lane-dense pairwise tensor).
    ep_l1_ref, node_l1_ref = point_similarity_ref(vp, ep_last, params, "l1")
    ep_l1, node_l1 = point_similarity(vp, ep_last, params, "l1", matmul_dtype=jnp.float32)
    jax.block_until_ready((ep_l1, node_l1))
    assert jnp.allclose(node_l1, node_l1_ref, atol=1e-3, rtol=1e-3)
    assert jnp.allclose(ep_l1, ep_l1_ref, atol=5e-3, rtol=5e-3)

    print("KERNEL_OK")
</pallas_src>

<mosaic_0001>
module attributes {stable_mosaic.version = 11 : i64} {
  func.func @_point_sim_kernel(%arg0: i32, %arg1: i32, %arg2: memref<1x16x32xf32, #tpu.memory_space<vmem>>, %arg3: memref<1x32x16xf32, #tpu.memory_space<vmem>>, %arg4: memref<1x16x16xf32, #tpu.memory_space<vmem>>, %arg5: memref<32x32xf32, #tpu.memory_space<vmem>>, %arg6: memref<1x32xf32, #tpu.memory_space<vmem>>, %arg7: memref<16x32xf32, #tpu.memory_space<vmem>>, %arg8: memref<1x16xf32, #tpu.memory_space<vmem>>, %arg9: memref<1x16xf32, #tpu.memory_space<vmem>>, %arg10: memref<1x1xf32, #tpu.memory_space<vmem>>, %arg11: memref<1x16x16xf32, #tpu.memory_space<vmem>>, %arg12: memref<1x16x16xf32, #tpu.memory_space<vmem>>) attributes {dimension_semantics = [#tpu.dimension_semantics<parallel>, #tpu.dimension_semantics<parallel>], iteration_bounds = array<i64: 2, 1>, scalar_prefetch = 0 : i64, scratch_operands = 0 : i64, tpu.core_type = #tpu.core_type<tc>, window_params = [{transform_indices = @transform_0, window_bounds = array<i64: 1, 16, 32>}, {transform_indices = @transform_1, window_bounds = array<i64: 1, 32, 16>}, {transform_indices = @transform_2, window_bounds = array<i64: 1, 16, 16>}, {pipeline_mode = #tpu.pipeline_mode<synchronous>, transform_indices = @transform_3, window_bounds = array<i64: 32, 32>}, {pipeline_mode = #tpu.pipeline_mode<synchronous>, transform_indices = @transform_4, window_bounds = array<i64: 1, 32>}, {pipeline_mode = #tpu.pipeline_mode<synchronous>, transform_indices = @transform_5, window_bounds = array<i64: 16, 32>}, {pipeline_mode = #tpu.pipeline_mode<synchronous>, transform_indices = @transform_6, window_bounds = array<i64: 1, 16>}, {pipeline_mode = #tpu.pipeline_mode<synchronous>, transform_indices = @transform_7, window_bounds = array<i64: 1, 16>}, {pipeline_mode = #tpu.pipeline_mode<synchronous>, transform_indices = @transform_8, window_bounds = array<i64: 1, 1>}, {transform_indices = @transform_9, window_bounds = array<i64: 1, 16, 16>}, {transform_indices = @transform_10, window_bounds = array<i64: 1, 16, 16>}]} {
    %c0 = arith.constant 0 : index
    %c0_0 = arith.constant 0 : index
    %c0_1 = arith.constant 0 : index
    %0 = vector.load %arg2[%c0, %c0_0, %c0_1] : memref<1x16x32xf32, #tpu.memory_space<vmem>>, vector<1x16x32xf32>
    %1 = vector.shape_cast %0 : vector<1x16x32xf32> to vector<16x32xf32>
    %c0_2 = arith.constant 0 : index
    %c0_3 = arith.constant 0 : index
    %c0_4 = arith.constant 0 : index
    %2 = vector.load %arg3[%c0_2, %c0_3, %c0_4] : memref<1x32x16xf32, #tpu.memory_space<vmem>>, vector<1x32x16xf32>
    %3 = vector.shape_cast %2 : vector<1x32x16xf32> to vector<32x16xf32>
    %c0_5 = arith.constant 0 : index
    %c0_6 = arith.constant 0 : index
    %4 = vector.load %arg5[%c0_5, %c0_6] : memref<32x32xf32, #tpu.memory_space<vmem>>, vector<32x32xf32>
    %c0_7 = arith.constant 0 : index
    %c0_8 = arith.constant 0 : index
    %5 = vector.load %arg6[%c0_7, %c0_8] : memref<1x32xf32, #tpu.memory_space<vmem>>, vector<1x32xf32>
    %cst = arith.constant dense<0.000000e+00> : vector<16x16xf32>
    %6 = tpu.matmul %1, %3, %cst {dimension_numbers = #tpu.dot_dimension_numbers<[1], [0], [0], [1], [0, 0, 1, 1], [], []>} : vector<16x32xf32>, vector<32x16xf32>, vector<16x16xf32> -> vector<16x16xf32>
    %7 = arith.mulf %1, %1 : vector<16x32xf32>
    %cst_9 = arith.constant dense<0.000000e+00> : vector<16xf32>
    %8 = vector.multi_reduction <add>, %7, %cst_9 [1] : vector<16x32xf32> to vector<16xf32>
    %9 = vector.shape_cast %8 : vector<16xf32> to vector<16x1xf32>
    %10 = arith.mulf %3, %3 : vector<32x16xf32>
    %cst_10 = arith.constant dense<0.000000e+00> : vector<16xf32>
    %11 = vector.multi_reduction <add>, %10, %cst_10 [0] : vector<32x16xf32> to vector<16xf32>
    %12 = vector.shape_cast %11 : vector<16xf32> to vector<1x16xf32>
    %13 = vector.broadcast %9 : vector<16x1xf32> to vector<16x16xf32>
    %14 = vector.broadcast %12 : vector<1x16xf32> to vector<16x16xf32>
    %15 = arith.addf %13, %14 : vector<16x16xf32>
    %cst_11 = arith.constant 2.000000e+00 : f32
    %16 = vector.broadcast %cst_11 : f32 to vector<16x16xf32>
    %17 = arith.mulf %16, %6 : vector<16x16xf32>
    %18 = arith.subf %15, %17 : vector<16x16xf32>
    %cst_12 = arith.constant 0.000000e+00 : f32
    %19 = vector.broadcast %cst_12 : f32 to vector<16x16xf32>
    %20 = arith.subf %19, %18 : vector<16x16xf32>
    %c0_13 = arith.constant 0 : index
    %c0_14 = arith.constant 0 : index
    %c0_15 = arith.constant 0 : index
    %21 = vector.load %arg12[%c0_13, %c0_14, %c0_15] : memref<1x16x16xf32, #tpu.memory_space<vmem>>, vector<1x16x16xf32>
    %22 = vector.shape_cast %21 : vector<1x16x16xf32> to vector<16x16xf32>
    %23 = vector.shape_cast %20 : vector<16x16xf32> to vector<1x16x16xf32>
    tpu.vector_store %arg12[%c0_13, %c0_14, %c0_15], %23 {strides = array<i32>} : memref<1x16x16xf32, #tpu.memory_space<vmem>>, vector<1x16x16xf32>,
    %24 = arith.mulf %1, %1 : vector<16x32xf32>
    %25 = arith.mulf %3, %3 : vector<32x16xf32>
    %cst_16 = arith.constant dense<0.000000e+00> : vector<16x32xf32>
    %26 = tpu.matmul %24, %4, %cst_16 {dimension_numbers = #tpu.dot_dimension_numbers<[1], [1], [0], [0], [0, 0, 1, 0], [], []>} : vector<16x32xf32>, vector<32x32xf32>, vector<16x32xf32> -> vector<16x32xf32>
    %cst_17 = arith.constant dense<0.000000e+00> : vector<32x16xf32>
    %27 = tpu.matmul %4, %25, %cst_17 {dimension_numbers = #tpu.dot_dimension_numbers<[1], [0], [0], [1], [0, 0, 1, 1], [], []>} : vector<32x32xf32>, vector<32x16xf32>, vector<32x16xf32> -> vector<32x16xf32>
    %28 = vector.shape_cast %1 : vector<16x32xf32> to vector<16x1x32xf32>
    %cst_18 = arith.constant -2.000000e+00 : f32
    %29 = vector.broadcast %cst_18 : f32 to vector<32x32xf32>
    %30 = arith.mulf %29, %4 : vector<32x32xf32>
    %31 = vector.shape_cast %30 : vector<32x32xf32> to vector<1x32x32xf32>
    %32 = vector.broadcast %28 : vector<16x1x32xf32> to vector<16x32x32xf32>
    %33 = vector.broadcast %31 : vector<1x32x32xf32> to vector<16x32x32xf32>
    %34 = arith.mulf %32, %33 : vector<16x32x32xf32>
    %35 = vector.shape_cast %34 : vector<16x32x32xf32> to vector<512x32xf32>
    %cst_19 = arith.constant dense<0.000000e+00> : vector<512x16xf32>
    %36 = tpu.matmul %35, %3, %cst_19 {dimension_numbers = #tpu.dot_dimension_numbers<[1], [0], [0], [1], [0, 0, 1, 1], [], []>} : vector<512x32xf32>, vector<32x16xf32>, vector<512x16xf32> -> vector<512x16xf32>
    %37 = vector.broadcast %5 : vector<1x32xf32> to vector<16x32xf32>
    %38 = arith.addf %26, %37 : vector<16x32xf32>
    %39 = vector.shape_cast %38 : vector<16x32xf32> to vector<16x32x1xf32>
    %40 = vector.shape_cast %27 : vector<32x16xf32> to vector<1x32x16xf32>
    %41 = vector.broadcast %39 : vector<16x32x1xf32> to vector<16x32x16xf32>
    %42 = vector.broadcast %40 : vector<1x32x16xf32> to vector<16x32x16xf32>
    %43 = arith.addf %41, %42 : vector<16x32x16xf32>
    %44 = vector.shape_cast %36 : vector<512x16xf32> to vector<16x32x16xf32>
    %45 = arith.addf %43, %44 : vector<16x32x16xf32>
    %cst_20 = arith.constant 0.00999999977 : f32
    %46 = vector.broadcast %cst_20 : f32 to vector<16x32x16xf32>
    %47 = arith.mulf %46, %45 : vector<16x32x16xf32>
    %48 = arith.maximumf %45, %47 : vector<16x32x16xf32>
    %c0_21 = arith.constant 0 : index
    %c0_22 = arith.constant 0 : index
    %49 = vector.load %arg7[%c0_21, %c0_22] : memref<16x32xf32, #tpu.memory_space<vmem>>, vector<16x32xf32>
    %50 = vector.shape_cast %49 : vector<16x32xf32> to vector<1x16x32xf32>
    %51 = vector.shape_cast %50 : vector<1x16x32xf32> to vector<1x16x32xf32>
    %52 = vector.broadcast %51 : vector<1x16x32xf32> to vector<16x16x32xf32>
    %cst_23 = arith.constant dense<0.000000e+00> : vector<16x16x16xf32>
    %53 = tpu.matmul %52, %48, %cst_23 {dimension_numbers = #tpu.dot_dimension_numbers<[2], [1], [1], [2], [0, 0, 0, 1, 1, 2], [0], [0]>} : vector<16x16x32xf32>, vector<16x32x16xf32>, vector<16x16x16xf32> -> vector<16x16x16xf32>
    %c0_24 = arith.constant 0 : index
    %c0_25 = arith.constant 0 : index
    %54 = vector.load %arg8[%c0_24, %c0_25] : memref<1x16xf32, #tpu.memory_space<vmem>>, vector<1x16xf32>
    %55 = vector.shape_cast %54 : vector<1x16xf32> to vector<1x16x1xf32>
    %56 = vector.broadcast %55 : vector<1x16x1xf32> to vector<16x16x16xf32>
    %57 = arith.addf %53, %56 : vector<16x16x16xf32>
    %cst_26 = arith.constant 0.00999999977 : f32
    %58 = vector.broadcast %cst_26 : f32 to vector<16x16x16xf32>
    %59 = arith.mulf %58, %57 : vector<16x16x16xf32>
    %60 = arith.maximumf %57, %59 : vector<16x16x16xf32>
    %c0_27 = arith.constant 0 : index
    %c0_28 = arith.constant 0 : index
    %61 = vector.load %arg9[%c0_27, %c0_28] : memref<1x16xf32, #tpu.memory_space<vmem>>, vector<1x16xf32>
    %62 = vector.shape_cast %61 : vector<1x16xf32> to vector<1x16x1xf32>
    %63 = vector.broadcast %62 : vector<1x16x1xf32> to vector<16x16x16xf32>
    %64 = arith.mulf %60, %63 : vector<16x16x16xf32>
    %cst_29 = arith.constant dense<0.000000e+00> : vector<16x16xf32>
    %65 = vector.multi_reduction <add>, %64, %cst_29 [1] : vector<16x16x16xf32> to vector<16x16xf32>
    %c0_30 = arith.constant 0 : index
    %c0_31 = arith.constant 0 : index
    %66 = vector.load %arg10[%c0_30, %c0_31] : memref<1x1xf32, #tpu.memory_space<vmem>>, vector<1x1xf32>
    %67 = vector.broadcast %66 : vector<1x1xf32> to vector<16x16xf32>
    %68 = arith.addf %65, %67 : vector<16x16xf32>
    %cst_32 = arith.constant 0.000000e+00 : f32
    %69 = vector.broadcast %cst_32 : f32 to vector<16x16xf32>
    %70 = arith.subf %69, %68 : vector<16x16xf32>
    %71 = math.exp %70 : vector<16x16xf32>
    %cst_33 = arith.constant 1.000000e+00 : f32
    %72 = vector.broadcast %cst_33 : f32 to vector<16x16xf32>
    %73 = arith.addf %72, %71 : vector<16x16xf32>
    %74 = tpu.reciprocal %73 {approx = true} : vector<16x16xf32> -> vector<16x16xf32>
    %c0_34 = arith.constant 0 : index
    %c0_35 = arith.constant 0 : index
    %c0_36 = arith.constant 0 : index
    %75 = vector.load %arg4[%c0_34, %c0_35, %c0_36] : memref<1x16x16xf32, #tpu.memory_space<vmem>>, vector<1x16x16xf32>
    %76 = vector.shape_cast %75 : vector<1x16x16xf32> to vector<16x16xf32>
    %77 = tpu.iota {dimensions = array<i32: 0>} : vector<16x16xi32>
    %c16_i32 = arith.constant 16 : i32
    %78 = arith.muli %arg1, %c16_i32 : i32
    %79 = vector.broadcast %78 : i32 to vector<16x16xi32>
    %80 = arith.addi %77, %79 : vector<16x16xi32>
    %81 = tpu.iota {dimensions = array<i32: 1>} : vector<16x16xi32>
    %82 = arith.cmpi eq, %80, %81 : vector<16x16xi32>
    %cst_37 = arith.constant 0.000000e+00 : f32
    %83 = vector.broadcast %cst_37 : f32 to vector<16x16xf32>
    %84 = arith.select %82, %83, %76 : vector<16x16xi1>, vector<16x16xf32>
    %cst_38 = arith.constant dense<0.000000e+00> : vector<16xf32>
    %85 = vector.multi_reduction <add>, %84, %cst_38 [1] : vector<16x16xf32> to vector<16xf32>
    %86 = vector.shape_cast %85 : vector<16xf32> to vector<16x1xf32>
    %87 = arith.mulf %74, %84 : vector<16x16xf32>
    %88 = math.absf %87 : vector<16x16xf32>
    %cst_39 = arith.constant dense<0.000000e+00> : vector<16xf32>
    %89 = vector.multi_reduction <add>, %88, %cst_39 [1] : vector<16x16xf32> to vector<16xf32>
    %90 = vector.shape_cast %89 : vector<16xf32> to vector<16x1xf32>
    %cst_40 = arith.constant 9.99999996E-13 : f32
    %91 = vector.broadcast %cst_40 : f32 to vector<16x1xf32>
    %92 = arith.maximumf %90, %91 : vector<16x1xf32>
    %93 = tpu.reciprocal %92 {approx = true} : vector<16x1xf32> -> vector<16x1xf32>
    %94 = arith.mulf %86, %93 : vector<16x1xf32>
    %95 = vector.broadcast %94 : vector<16x1xf32> to vector<16x16xf32>
    %96 = arith.mulf %87, %95 : vector<16x16xf32>
    %97 = arith.extui %82 : vector<16x16xi1> to vector<16x16xi32>
    %98 = arith.sitofp %97 : vector<16x16xi32> to vector<16x16xf32>
    %99 = arith.addf %96, %98 : vector<16x16xf32>
    %cst_41 = arith.constant 9.99999997E-7 : f32
    %100 = vector.broadcast %cst_41 : f32 to vector<16x16xf32>
    %101 = arith.addf %99, %100 : vector<16x16xf32>
    %cst_42 = arith.constant dense<0.000000e+00> : vector<16xf32>
    %102 = vector.multi_reduction <add>, %101, %cst_42 [1] : vector<16x16xf32> to vector<16xf32>
    %103 = vector.shape_cast %102 : vector<16xf32> to vector<16x1xf32>
    %104 = tpu.reciprocal %103 {approx = true} : vector<16x1xf32> -> vector<16x1xf32>
    %105 = vector.broadcast %104 : vector<16x1xf32> to vector<16x16xf32>
    %106 = arith.mulf %101, %105 : vector<16x16xf32>
    %c0_43 = arith.constant 0 : index
    %c0_44 = arith.constant 0 : index
    %c0_45 = arith.constant 0 : index
    %107 = vector.load %arg11[%c0_43, %c0_44, %c0_45] : memref<1x16x16xf32, #tpu.memory_space<vmem>>, vector<1x16x16xf32>
    %108 = vector.shape_cast %107 : vector<1x16x16xf32> to vector<16x16xf32>
    %109 = vector.shape_cast %106 : vector<16x16xf32> to vector<1x16x16xf32>
    tpu.vector_store %arg11[%c0_43, %c0_44, %c0_45], %109 {strides = array<i32>} : memref<1x16x16xf32, #tpu.memory_space<vmem>>, vector<1x16x16xf32>,
    return
  }
  func.func @transform_0(%arg0: i32, %arg1: i32) -> (i32, i32, i32) {
    %c0_i32 = arith.constant 0 : i32
    %c0_i32_0 = arith.constant 0 : i32
    return %arg0, %arg1, %c0_i32 : i32, i32, i32
  }
  func.func @transform_1(%arg0: i32, %arg1: i32) -> (i32, i32, i32) {
    %c0_i32 = arith.constant 0 : i32
    %c0_i32_0 = arith.constant 0 : i32
    %c0_i32_1 = arith.constant 0 : i32
    return %arg0, %c0_i32, %c0_i32_0 : i32, i32, i32
  }
  func.func @transform_2(%arg0: i32, %arg1: i32) -> (i32, i32, i32) {
    %c0_i32 = arith.constant 0 : i32
    %c0_i32_0 = arith.constant 0 : i32
    return %arg0, %arg1, %c0_i32 : i32, i32, i32
  }
  func.func @transform_3(%arg0: i32, %arg1: i32) -> (i32, i32) {
    %c0_i32 = arith.constant 0 : i32
    %c0_i32_0 = arith.constant 0 : i32
    %c0_i32_1 = arith.constant 0 : i32
    return %c0_i32, %c0_i32_0 : i32, i32
  }
  func.func @transform_4(%arg0: i32, %arg1: i32) -> (i32, i32) {
    %c0_i32 = arith.constant 0 : i32
    %c0_i32_0 = arith.constant 0 : i32
    %c0_i32_1 = arith.constant 0 : i32
    return %c0_i32, %c0_i32_0 : i32, i32
  }
  func.func @transform_5(%arg0: i32, %arg1: i32) -> (i32, i32) {
    %c0_i32 = arith.constant 0 : i32
    %c0_i32_0 = arith.constant 0 : i32
    %c0_i32_1 = arith.constant 0 : i32
    return %c0_i32, %c0_i32_0 : i32, i32
  }
  func.func @transform_6(%arg0: i32, %arg1: i32) -> (i32, i32) {
    %c0_i32 = arith.constant 0 : i32
    %c0_i32_0 = arith.constant 0 : i32
    %c0_i32_1 = arith.constant 0 : i32
    return %c0_i32, %c0_i32_0 : i32, i32
  }
  func.func @transform_7(%arg0: i32, %arg1: i32) -> (i32, i32) {
    %c0_i32 = arith.constant 0 : i32
    %c0_i32_0 = arith.constant 0 : i32
    %c0_i32_1 = arith.constant 0 : i32
    return %c0_i32, %c0_i32_0 : i32, i32
  }
  func.func @transform_8(%arg0: i32, %arg1: i32) -> (i32, i32) {
    %c0_i32 = arith.constant 0 : i32
    %c0_i32_0 = arith.constant 0 : i32
    %c0_i32_1 = arith.constant 0 : i32
    return %c0_i32, %c0_i32_0 : i32, i32
  }
  func.func @transform_9(%arg0: i32, %arg1: i32) -> (i32, i32, i32) {
    %c0_i32 = arith.constant 0 : i32
    %c0_i32_0 = arith.constant 0 : i32
    return %arg0, %arg1, %c0_i32 : i32, i32, i32
  }
  func.func @transform_10(%arg0: i32, %arg1: i32) -> (i32, i32, i32) {
    %c0_i32 = arith.constant 0 : i32
    %c0_i32_0 = arith.constant 0 : i32
    return %arg0, %arg1, %c0_i32 : i32, i32, i32
  }
}

</mosaic_0001>

<bundles_post_ra>
// kernel: tpu_custom_call.1
= control target key start
LH: loop header
LB: loop body
LE: loop exit
PB: predicated region body
PF: predicated region fallthrough
CT: control target
= control target key end

     0   :  { %s6583_s0 = inlined_call_operand.vmem [shape: f32[2,16,32], index: 0, kind: input, shape index: {}]   ;;  %s6584_s1 = inlined_call_operand.vmem [shape: f32[2,32,16], index: 1, kind: input, shape index: {}]   ;;  %s6585_s2 = inlined_call_operand.vmem [shape: f32[2,16,16], index: 2, kind: input, shape index: {}]   ;;  %s6586_s3 = inlined_call_operand.vmem [shape: f32[32,32], index: 3, kind: input, shape index: {}]   ;;  %s6587_s4 = inlined_call_operand.vmem [shape: f32[1,32], index: 4, kind: input, shape index: {}]   ;;  %s6588_s5 = inlined_call_operand.hbm [shape: f32[16,32], index: 5, kind: input, shape index: {}]   ;;  %s6589_s6 = inlined_call_operand.vmem [shape: f32[1,16], index: 6, kind: input, shape index: {}]   ;;  %s6590_s7 = inlined_call_operand.vmem [shape: f32[1,16], index: 7, kind: input, shape index: {}]   ;;  %s6591_s8 = inlined_call_operand.<no memory space> [shape: f32[1,1], index: 8, kind: input, shape index: {}]   ;;  %s6592_s9 = inlined_call_operand.hbm [shape: f32[2,16,16], index: 9, kind: output, shape index: {0}]   ;;  %s6593_s10 = inlined_call_operand.hbm [shape: f32[2,16,16], index: 10, kind: output, shape index: {1}]  }
   0x1   :  { %6602 = sst [smem:[#allocation21_spill]] %s6583_s0  ;;  %v16_v0 = vstv %s6591_s8 }
   0x2   :  { %6603 = sst [smem:[#allocation22_spill]] %s6584_s1  ;;  %17 = vst [vmem:[#allocation2] sm:$0x1] %v16_v0 }
   0x3   :  { %18 = vsyncpa [#allocation4], 0 }
   0x4   :  { %19 = vsyncpa [#allocation5], 0 }
   0x5   :  { %21 = vsyncpa [#allocation5 + $0x1], 0 }
   0x6   :  { %22 = vsyncpa [#allocation8], 0 }
   0x7   :  { %24 = vsyncpa [#allocation8 + $0x1], 0  ;;  %s5363_s15 = smov 0   ;;  %s5365_s16 = smov 0  }
   0x8   :  { %s5367_s17 = smov 0   ;;  %s5369_s18 = smov 0  }
   0x9   :  { %s5371_s19 = smov 0   ;;  %s5373_s20 = smov 0  }
   0xa LB: > { %s4361_s8 = sadd.s32 4294967295, %s5293_s20   ;;  %s4362_s21 = sadd.s32 4294967294, %s5293_s20   ;;  %s5293_s20 = sphi %s5373_s20, %s30_s20   ;;  %s5289_s19 = sphi %s5371_s19, %s6634_s19   ;;  %s5285_s18 = sphi %s5369_s18, %s6633_s18   ;;  %s5281_s17 = sphi %s5367_s17, %s6632_s17   ;;  %s5277_s16 = sphi %s5365_s16, %s6631_s16   ;;  %s5273_s15 = sphi %s5363_s15, %s6630_s15  }
   0xb   : > { %s42_s22 = sadd.s32 1, %s5289_s19  ;;  %s259_s23 = sadd.s32 1, %s5281_s17 }
   0xc   : > { %p44_p0 = scmp.ge.s32.totalorder %s42_s22, 2  ;;  %p269_p1 = scmp.ne.s32.totalorder %s5281_s17, %s5277_s16 }
   0xd   : > { %p270_p2 = scmp.eq.s32.totalorder %s4361_s8, 1  ;;  %p275_p3 = scmp.ne.s32.totalorder %s5277_s16, %s5273_s15 }
   0xe   : > { %s6636_s22 = smov (%p44_p0, %s42_s22), 0  ;;  %p276_p5 = scmp.eq.s32.totalorder %s4362_s21, 1 }
   0xf   : > { %p5403_p4 = por %p270_p2, %p269_p1  ;;  %s254_s25 = ssub.s32 %s5289_s19, %s6636_s22 }
  0x10   : > { %p4363_p6 = scmp.ge.s32.totalorder %s5293_s20, 1  ;;  %p257_p7 = scmp.eq.s32.totalorder %s254_s25, 0 }
  0x11   : > { %p5410_p8 = por %p276_p5, %p275_p3  ;;  %p311_p9 = scmp.lt.s32.totalorder %s5293_s20, 3 }
  0x12   : > { %s5416_s27 = scalar_select %p257_p7, %s5281_s17, %s259_s23  }
  0x13   : > { %p5418_p10 = pnand %p4363_p6, %p311_p9  ;;  %p5422_p11 = scmp.eq.s32.totalorder %s4361_s8, 0 }
  0x14   : > { %s5295_s30 = smov [#allocation3]  }
  0x15   : > { %p5011_p12 = pneg %p5418_p10  ;;  %s329_s11 = sshll.u32 %s5295_s30, 4  ;;  %s330_s11 = int_to_ptr.vmem [resolvable:$true] %s329_s11 }
  0x16   : > { %s5168_s12 = scalar_lea.vmem %s330_s11, 256  ;;  %p5176_p5 = scmp.lt.s32.totalorder %s330_s11, %s330_s11 }
  0x17   : > { %p5012_p13 = pnand %p5422_p11, %p5011_p12  ;;  %p5169_p1 = scmp.ne.s32.totalorder %s330_s11, %s5168_s12 }
  0x18   : > { %p5177_p6 = scmp.lt.s32.totalorder %s5168_s12, %s5168_s12 }
  0x19   : > { %p5159_p0 = pneg %p5012_p13 }
  0x1a   : > { %p5178_p7 = por %p5177_p6, %p5176_p5 }
  0x1b   : > { %p5171_p2 = pnand %p5169_p1, %p5159_p0 }
  0x1d   : > { %p5172_p3 = pneg %p5171_p2 }
  0x1f   : > { %p5179_p9 = pnand %p5178_p7, %p5172_p3 }
  0x21   : > { %5182 = shalt.err (!%p5179_p9)
}
  0x22   : > { %s5296_s13 = smov 128   ;;  %s5297_s14 = smov 8  }
  0x23   : > { %5014 = dma.hbm_to_vmem [thread:$0]  (!%p5012_p13), %s6588_s5, 256, %s330_s11, [#allocation4], %s5296_s13, %s5296_s13, %s5297_s14  }
  0x24   : > { %388 = sbr.rel (%p5418_p10) target bundleno = 1146 (0x47a), region = 56 }
  0x29   : > { %5260 = dma.done.wait (%p5422_p11), [#allocation4], 256  }
  0x2a   : > { %5262 = vsyncadd (%p5422_p11), [#allocation4], 4294967040  ;;  %p450_p12 = scmp.lt.s32.totalorder %s5285_s18, 1  ;;  %v706_v1 = vlaneseq  ;;  %v5298_v2 = vmov 1966171168   ;;  %s6608_s1 = sld [smem:[#allocation22_spill]] }
  0x2b   : > { %v704_v3 = vunpack.c.l.s4 %v5298_v2  ;;  %vm487_vm0 = vcmask 261120   ;;  %v5471_v15 = vld [vmem:[%s6586_s3] sm:$0xff]  ;;  %s6613_s0 = sld [smem:[#allocation21_spill]]  ;;  %vm581_vm1 = vcmask 130048   ;;  %v483_v29 = vld [vmem:[%s6586_s3 + $0x8] sm:$0xff]  ;;  %v485_v30 = vld [vmem:[%s6586_s3 + $0x18] sm:$0xff] }
  0x2c   : > { %s451_s23 = scalar_select %p450_p12, %s5285_s18, 1  ;;  %v5441_v5 = vshrl.u32 %v706_v1, 7  ;;  %v5449_v7 = vand.u32 127, %v706_v1  ;;  %4706 = vmatprep.mubr.msk.f32.mxu1 %vm487_vm0, %v5471_v15  ;;  %v5529_v31 = vmul.f32 -2.0, %v5471_v15  ;;  %v484_v32 = vld [vmem:[%s6586_s3 + $0x10] sm:$0xff]  ;;  %v5552_v38 = vmul.f32 -2.0, %v483_v29 }
  0x2d   : > { %v705_v4 = vunpack.c.0.s8 %v704_v3  ;;  %v5555_v39 = vmul.f32 -2.0, %v484_v32  ;;  %v5565_v41 = vmul.f32 -2.0, %v485_v30  ;;  %vm3852_vm4 = vcmask 1041409  }
  0x2e   : > { %s4499_s25 = sshll.u32 %s451_s23, 5  ;;  %s4498_s12 = sshll.u32 %s451_s23, 4  ;;  %v5447_v6 = vadd.s32 8, %v5441_v5  ;;  %6610 = vst [vmem:[#allocation13_spill] sm:$0xff] %v5449_v7  ;;  %vm3761_vm2 = vcmp.eq.s32.totalorder %v5441_v5, %v5449_v7  ;;  %v5505_v25 = vsub.s32 0, %v5441_v5  ;;  %vm3855_vm5 = vcmask 1042434  }
  0x2f   : > { %s472_s14 = scalar_lea.vmem %s6585_s2, %s4498_s12  ;;  %v5479_v16 = vsub.s32 %v705_v4, %v5441_v5  ;;  %vm3858_vm6 = vcmask 1043459   ;;  %vm3861_vm7 = vcmask 1044484   ;;  %vm3864_vm8 = vcmask 1045509  }
  0x30   : > { %s463_s11 = scalar_lea.vmem %s6608_s1, %s4499_s25  ;;  %6609 = vst [vmem:[#allocation12_spill] sm:$0xff] %v5447_v6  ;;  %v3750_v19 = vld [vmem:[%s472_s14] sm:$0xff]  ;;  %vm3762_vm3 = vcmp.eq.s32.totalorder %v5447_v6, %v5449_v7  ;;  %v3751_v22 = vld [vmem:[%s472_s14 + $0x8] sm:$0xff]  ;;  %vm3867_vm9 = vcmask 1046534   ;;  %vm3870_vm10 = vcmask 1047559   ;;  %s6601_s14 = sshll.u32 %s5285_s18, 8 }
  0x31   : > { %v481_v8 = vld [vmem:[%s463_s11 + $0x18] sm:$0xff]  ;;  %v5451_v9 = vld [vmem:[%s463_s11 + $0x10] sm:$0xff]  ;;  %v5453_v10 = vld [vmem:[%s463_s11 + $0x8] sm:$0xff]  ;;  %s5476_s30 = scalar_lea.vmem %s6613_s0, %s4498_s12  ;;  %v5510_v26 = vsel %vm3761_vm2, 0.0, %v3750_v19  ;;  %v5515_v27 = vsel %vm3762_vm3, 0.0, %v3751_v22  ;;  %s6478_s25 = scalar_lea.hbm %s6593_s10, %s6601_s14 }
  0x32   : > { %v5458_v11 = vmul.f32 %v481_v8, %v481_v8  ;;  %v5462_v12 = vmul.f32 %v5451_v9, %v5451_v9  ;;  %v578_v13 = vmul.f32 %v5453_v10, %v5453_v10  ;;  %v5466_v14 = vld [vmem:[%s463_s11] sm:$0xff]  ;;  %4687 = vmatprep.subr.mxu0 %v481_v8  ;;  %v5547_v36 = vld [vmem:[%s5476_s30 + $0x8] sm:$0xff]  ;;  %s6439_s11 = sand.u32 1, %s5277_s16  }
  0x33   : > { %v577_v17 = vmul.f32 %v5466_v14, %v5466_v14  ;;  %4688 = vmatpush3.msra.mxu0 %v481_v8  ;;  %v5495_v21 = vld [vmem:[%s5476_s30] sm:$0xff]  ;;  %v5579_v45 = vmul.f32 %v5547_v36, %v5547_v36  ;;  %s4368_s12 = sshll.u32 %s6439_s11, 4 }
  0x34   : > { %6611 = vst [vmem:[#allocation14_spill] sm:$0xff] %v5458_v11  ;;  %6612 = vst [vmem:[#allocation15_spill] sm:$0xff] %v5462_v12  ;;  %4698 = vmatprep.subr.mxu1 %v5458_v11  ;;  %v583_v18 = vsel %vm581_vm1, %v578_v13, 0.0  ;;  %4689 = vmatprep.subr.mxu0 %v5451_v9  ;;  %v709_v24 = vrot.slane %v5495_v21, %v5479_v16  ;;  %v5543_v34 = vmul.f32 %v5495_v21, %v5495_v21  ;;  %s6445_s29 = scalar_lea.vmem [#allocation7], %s4368_s12  ;;  %s6466_s13 = scalar_lea.vmem [#allocation6], %s4368_s12 }
  0x35   : > { %4699 = vmatpush3.msra.mxu1 %v5458_v11  ;;  %v582_v20 = vsel %vm581_vm1, %v577_v17, 0.0  ;;  %4690 = vmatpush3.msra.mxu0 %v5451_v9  ;;  %6616 = vst [vmem:[#allocation18_spill] sm:$0xff] %v5579_v45  ;;  %v702_v53 = vcombine.high %v5495_v21, %v5495_v21  ;;  %s4205_s8 = sshll.u32 %s6445_s29, 4  ;;  %s5301_s12 = smov [#allocation7]   ;;  %s6480_s8 = int_to_ptr.vmem [resolvable:$true] %s4205_s8 }
  0x36   : > { %4700 = vmatprep.subr.mxu1 %v5462_v12  ;;  %v5499_v23 = vadd.f32 %v583_v18, %v582_v20  ;;  %4691 = vmatprep.subr.mxu0 %v5453_v10  ;;  %v725_v28 = vrot.slane %v709_v24, %v5479_v16  ;;  %6615 = vst [vmem:[#allocation17_spill] sm:$0xff] %v5543_v34  ;;  %s5183_s28 = scalar_lea.vmem %s6480_s8, 256  ;;  %s5187_s0 = sshll.u32 %s5301_s12, 4  ;;  %s5188_s0 = int_to_ptr.vmem [resolvable:$false] %s5187_s0 }
  0x37   : > { %4701 = vmatpush3.msra.mxu1 %v5462_v12  ;;  %4692 = vmatpush3.msra.mxu0 %v5453_v10  ;;  %v717_v35 = vcombine.high %v709_v24, %v709_v24  ;;  %v716_v57 = vrot.slane %v702_v53, %v5479_v16  ;;  %p5184_p10 = scmp.ne.s32.totalorder %s6480_s8, %s5183_s28  ;;  %s5189_s1 = scalar_lea.vmem %s5188_s0, 512 }
  0x38   : > { %6614 = vst [vmem:[#allocation16_spill] sm:$0xff] %v5499_v23  ;;  %4702 = vmatprep.subr.mxu1 %v578_v13  ;;  %4693 = vmatprep.subr.mxu0 %v5466_v14  ;;  %v807_v33 = vrot.slane %v725_v28, %v5505_v25  ;;  %v747_v48 = vcombine.high %v725_v28, %v725_v28  ;;  %p5190_p0 = scmp.lt.s32.totalorder %s6480_s8, %s5188_s0  ;;  %p5191_p1 = scmp.lt.s32.totalorder %s5189_s1, %s5183_s28 }
  0x39   : > { %4703 = vmatpush3.msra.mxu1 %v578_v13  ;;  %4694 = vmatpush3.msra.mxu0 %v5466_v14  ;;  %v739_v40 = vrot.slane %v717_v35, %v5479_v16  ;;  %v732_v62 = vrot.slane %v716_v57, %v5479_v16  ;;  %v718_v2 = vcombine.high %v716_v57, %v716_v57  ;;  %p5185_p11 = pnand %p5184_p10, %p5403_p4 }
  0x3a   : > { %4704 = vmatprep.subr.mxu1 %v577_v17  ;;  %4695 = vmatprep.mubr.msk.f32.mxu0 %vm487_vm0, %v5495_v21  ;;  %v884_v37 = vmul.f32 %v807_v33, %v5529_v31  ;;  %v885_v42 = vmul.f32 %v807_v33, %v5552_v38  ;;  %v886_v43 = vmul.f32 %v807_v33, %v5555_v39  ;;  %p5192_p2 = por %p5191_p1, %p5190_p0 }
  0x3b   : > { %4705 = vmatpush3.msra.mxu1 %v577_v17  ;;  %4712 = vmatprep.subr.mxu0 %v481_v8  ;;  %v811_v44 = vrot.slane %v739_v40, %v5505_v25  ;;  %v887_v46 = vmul.f32 %v807_v33, %v5565_v41  ;;  %v815_v51 = vrot.slane %v747_v48, %v5505_v25  ;;  %p5186_p13 = pneg %p5185_p11 }
  0x3c   : > { %4707 = vmatmul.mubr.msk.f32.vlgmr.msra.gmra.mxu1 %vm487_vm0, %v483_v29  ;;  %4816 = vmatprep.subr.msk.mxu1 %vm487_vm0, %v485_v30  ;;  %v749_v55 = vcombine.high %v739_v40, %v739_v40  ;;  %v823_v1 = vrot.slane %v732_v62, %v5505_v25  ;;  %v748_v17 = vcombine.high %v732_v62, %v732_v62 }
  0x3d   : > { %4817 = vmatpush3.xpose.msk.msra.mxu1 %vm487_vm0, %v485_v30  ;;  %4709 = vmatprep.mubr.msk.f32.mxu1 %vm487_vm0, %v484_v32  ;;  %v888_v47 = vmul.f32 %v811_v44, %v5529_v31  ;;  %v889_v49 = vmul.f32 %v811_v44, %v5552_v38  ;;  %v890_v50 = vmul.f32 %v811_v44, %v5555_v39  ;;  %p5193_p3 = pnand %p5192_p2, %p5186_p13 }
  0x3e   : > { %4818 = vmatprep.subr.msk.mxu1 %vm487_vm0, %v484_v32  ;;  %4696 = vmatmul.mubr.msk.f32.vlgmr.msra.gmra.mxu0 %vm487_vm0, %v5547_v36  ;;  %v891_v52 = vmul.f32 %v811_v44, %v5565_v41  ;;  %v892_v54 = vmul.f32 %v815_v51, %v5529_v31  ;;  %v893_v56 = vmul.f32 %v815_v51, %v5552_v38 }
  0x3f   : > { %4713 = vmatpush3.msra.mxu0 %v481_v8  ;;  %4720 = vmatprep.mubr.msk.f32.mxu0 %vm487_vm0, %v884_v37  ;;  %v894_v58 = vmul.f32 %v815_v51, %v5555_v39  ;;  %v819_v59 = vrot.slane %v749_v55, %v5505_v25  ;;  %v895_v60 = vmul.f32 %v815_v51, %v5565_v41 }
  0x40   : > { %4710 = vmatmul.mubr.msk.f32.gmra.mxu1 %vm487_vm0, %v485_v30  ;;  %4714 = vmatprep.subr.mxu0 %v5451_v9  ;;  %v900_v4 = vmul.f32 %v823_v1, %v5529_v31  ;;  %v746_v8 = vrot.slane %v718_v2, %v5479_v16  ;;  %v831_v20 = vrot.slane %v748_v17, %v5505_v25 }
  0x41   : > { %4819 = vmatpush3.xpose.msk.msra.mxu1 %vm487_vm0, %v484_v32  ;;  %4824 = vmatprep.mubr.msk.f32.mxu1 %vm487_vm0, %v5543_v34  ;;  %v896_v61 = vmul.f32 %v819_v59, %v5529_v31  ;;  %v897_v63 = vmul.f32 %v819_v59, %v5552_v38  ;;  %v898_v0 = vmul.f32 %v819_v59, %v5555_v39 }
  0x42   : > { %4820 = vmatprep.subr.msk.mxu1 %vm487_vm0, %v483_v29  ;;  %4715 = vmatpush3.msra.mxu0 %v5451_v9  ;;  %v899_v3 = vmul.f32 %v819_v59, %v5565_v41  ;;  %v901_v9 = vmul.f32 %v823_v1, %v5552_v38  ;;  %v827_v13 = vrot.slane %v746_v8, %v5505_v25 }
  0x43   : > { %4716 = vmatprep.subr.mxu0 %v5453_v10  ;;  %v908_v22 = vmul.f32 %v831_v20, %v5529_v31  ;;  %v750_v24 = vcombine.high %v746_v8, %v746_v8  ;;  %v909_v28 = vmul.f32 %v831_v20, %v5552_v38  ;;  %v910_v30 = vmul.f32 %v831_v20, %v5555_v39 }
  0x44   : > { %4717 = vmatpush3.msra.mxu0 %v5453_v10  ;;  %v902_v10 = vmul.f32 %v823_v1, %v5555_v39  ;;  %v905_v18 = vmul.f32 %v827_v13, %v5552_v38  ;;  %v906_v19 = vmul.f32 %v827_v13, %v5555_v39  ;;  %v907_v21 = vmul.f32 %v827_v13, %v5565_v41 }
  0x45   : > { %4821 = vmatpush3.xpose.msk.msra.mxu1 %vm487_vm0, %v483_v29  ;;  %4718 = vmatprep.subr.mxu0 %v5466_v14  ;;  %v758_v29 = vrot.slane %v5547_v36, %v5479_v16  ;;  %v835_v32 = vrot.slane %v750_v24, %v5505_v25  ;;  %v911_v33 = vmul.f32 %v831_v20, %v5565_v41 }
  0x46   : > { %4822 = vmatprep.subr.msk.mxu1 %vm487_vm0, %v5471_v15  ;;  %4719 = vmatpush3.msra.mxu0 %v5466_v14  ;;  %v903_v14 = vmul.f32 %v823_v1, %v5565_v41  ;;  %v751_v59 = vcombine.high %v5547_v36, %v5547_v36 }
  0x47   : > { %4721 = vmatmul.mubr.msk.f32.vlgmr.msra.gmra.mxu0 %vm487_vm0, %v885_v42  ;;  %v912_v35 = vmul.f32 %v835_v32, %v5529_v31  ;;  %v774_v37 = vrot.slane %v758_v29, %v5479_v16  ;;  %v913_v40 = vmul.f32 %v835_v32, %v5552_v38  ;;  %v914_v42 = vmul.f32 %v835_v32, %v5555_v39 }
  0x48   : > { %4723 = vmatprep.mubr.msk.f32.mxu0 %vm487_vm0, %v886_v43  ;;  %v766_v44 = vcombine.high %v758_v29, %v758_v29  ;;  %v765_v1 = vrot.slane %v751_v59, %v5479_v16 }
  0x49   : > { %4823 = vmatpush3.xpose.msk.msra.mxu1 %vm487_vm0, %v5471_v15  ;;  %v904_v15 = vmul.f32 %v827_v13, %v5529_v31  ;;  %v839_v43 = vrot.slane %v774_v37, %v5505_v25 }
  0x4a   : > { %v788_v48 = vrot.slane %v766_v44, %v5479_v16 }
  0x4b   : > { %4724 = vmatmul.mubr.msk.f32.gmra.mxu0 %vm487_vm0, %v887_v46  ;;  %v915_v46 = vmul.f32 %v835_v32, %v5565_v41 }
  0x4c   : > { %4825 = vmatmul.mubr.msk.f32.vlgmr.msra.gmra.mxu1 %vm487_vm0, %v5579_v45  ;;  %4726 = vmatprep.mubr.msk.f32.mxu0 %vm487_vm0, %v888_v47  ;;  %v916_v47 = vmul.f32 %v839_v43, %v5529_v31  ;;  %v843_v51 = vrot.slane %v788_v48, %v5505_v25 }
  0x4e   : > { %v920_v53 = vmul.f32 %v843_v51, %v5529_v31  ;;  %v921_v55 = vmul.f32 %v843_v51, %v5552_v38 }
  0x4f   : > { %4727 = vmatmul.mubr.msk.f32.gmra.mxu0 %vm487_vm0, %v889_v49  ;;  %v917_v49 = vmul.f32 %v839_v43, %v5552_v38 }
  0x50   : > { %4729 = vmatprep.mubr.msk.f32.mxu0 %vm487_vm0, %v890_v50  ;;  %v918_v50 = vmul.f32 %v839_v43, %v5555_v39 }
  0x53   : > { %4730 = vmatmul.mubr.msk.f32.gmra.mxu0 %vm487_vm0, %v891_v52  ;;  %v919_v52 = vmul.f32 %v839_v43, %v5565_v41 }
  0x54   : > { %4732 = vmatprep.mubr.msk.f32.mxu0 %vm487_vm0, %v892_v54  ;;  %v796_v54 = vcombine.high %v774_v37, %v774_v37 }
  0x56   : > { %v847_v57 = vrot.slane %v796_v54, %v5505_v25 }
  0x57   : > { %4733 = vmatmul.mubr.msk.f32.gmra.mxu0 %vm487_vm0, %v893_v56  ;;  %v922_v56 = vmul.f32 %v843_v51, %v5555_v39 }
  0x58   : > { %4735 = vmatprep.mubr.msk.f32.mxu0 %vm487_vm0, %v894_v58  ;;  %v923_v58 = vmul.f32 %v843_v51, %v5565_v41  ;;  %v925_v62 = vmul.f32 %v847_v57, %v5552_v38  ;;  %v927_v36 = vmul.f32 %v847_v57, %v5565_v41 }
  0x5b   : > { %4736 = vmatmul.mubr.msk.f32.gmra.mxu0 %vm487_vm0, %v895_v60  ;;  %v924_v60 = vmul.f32 %v847_v57, %v5529_v31 }
  0x5c   : > { %4738 = vmatprep.mubr.msk.f32.mxu0 %vm487_vm0, %v896_v61  ;;  %v798_v61 = vcombine.high %v788_v48, %v788_v48 }
  0x5f   : > { %4739 = vmatmul.mubr.msk.f32.gmra.mxu0 %vm487_vm0, %v897_v63  ;;  %v926_v63 = vmul.f32 %v847_v57, %v5555_v39 }
  0x60   : > { %4741 = vmatprep.mubr.msk.f32.mxu0 %vm487_vm0, %v898_v0  ;;  %v851_v0 = vrot.slane %v798_v61, %v5505_v25 }
  0x62   : > { %v928_v2 = vmul.f32 %v851_v0, %v5529_v31  ;;  %v930_v8 = vmul.f32 %v851_v0, %v5555_v39  ;;  %v931_v13 = vmul.f32 %v851_v0, %v5565_v41 }
  0x63   : > { %4742 = vmatmul.mubr.msk.f32.gmra.mxu0 %vm487_vm0, %v899_v3  ;;  %v781_v3 = vrot.slane %v765_v1, %v5479_v16 }
  0x64   : > { %4744 = vmatprep.mubr.msk.f32.mxu0 %vm487_vm0, %v900_v4  ;;  %v929_v4 = vmul.f32 %v851_v0, %v5552_v38 }
  0x67   : > { %4745 = vmatmul.mubr.msk.f32.gmra.mxu0 %vm487_vm0, %v901_v9  ;;  %v855_v9 = vrot.slane %v781_v3, %v5505_v25 }
  0x68   : > { %4747 = vmatprep.mubr.msk.f32.mxu0 %vm487_vm0, %v902_v10  ;;  %v767_v10 = vcombine.high %v765_v1, %v765_v1 }
  0x69   : > { %v933_v17 = vmul.f32 %v855_v9, %v5552_v38  ;;  %v935_v20 = vmul.f32 %v855_v9, %v5565_v41 }
  0x6b   : > { %4748 = vmatmul.mubr.msk.f32.gmra.mxu0 %vm487_vm0, %v903_v14  ;;  %v932_v14 = vmul.f32 %v855_v9, %v5529_v31 }
  0x6c   : > { %4750 = vmatprep.mubr.msk.f32.mxu0 %vm487_vm0, %v904_v15  ;;  %v795_v15 = vrot.slane %v767_v10, %v5479_v16 }
  0x6e   : > { %v799_v32 = vcombine.high %v795_v15, %v795_v15 }
  0x6f   : > { %4751 = vmatmul.mubr.msk.f32.gmra.mxu0 %vm487_vm0, %v905_v18  ;;  %v934_v18 = vmul.f32 %v855_v9, %v5555_v39  ;;  %v1671_v9 = vsub.s32 3, %v5441_v5 }
  0x70   : > { %4753 = vmatprep.mubr.msk.f32.mxu0 %vm487_vm0, %v906_v19  ;;  %v859_v19 = vrot.slane %v795_v15, %v5505_v25  ;;  %v867_v37 = vrot.slane %v799_v32, %v5505_v25  ;;  %v1690_v15 = vsub.s32 4, %v5441_v5  ;;  %v1747_v32 = vsub.s32 7, %v5441_v5 }
  0x72   : > { %v937_v16 = vmul.f32 %v859_v19, %v5552_v38  ;;  %v938_v24 = vmul.f32 %v859_v19, %v5555_v39  ;;  %v939_v29 = vmul.f32 %v859_v19, %v5565_v41  ;;  %v945_v43 = vmul.f32 %v867_v37, %v5552_v38 }
  0x73   : > { %4754 = vmatmul.mubr.msk.f32.gmra.mxu0 %vm487_vm0, %v907_v21  ;;  %v936_v21 = vmul.f32 %v859_v19, %v5529_v31  ;;  %v946_v44 = vmul.f32 %v867_v37, %v5555_v39 }
  0x74   : > { %4756 = vmatprep.mubr.msk.f32.mxu0 %vm487_vm0, %v908_v22  ;;  %v797_v22 = vcombine.high %v781_v3, %v781_v3 }
  0x77   : > { %4757 = vmatmul.mubr.msk.f32.gmra.mxu0 %vm487_vm0, %v909_v28  ;;  %v863_v28 = vrot.slane %v797_v22, %v5505_v25 }
  0x78   : > { %4759 = vmatprep.mubr.msk.f32.mxu0 %vm487_vm0, %v910_v30 }
  0x79   : > { %v940_v30 = vmul.f32 %v863_v28, %v5529_v31 }
  0x7b   : > { %4760 = vmatmul.mubr.msk.f32.gmra.mxu0 %vm487_vm0, %v911_v33  ;;  %v941_v33 = vmul.f32 %v863_v28, %v5552_v38 }
  0x7c   : > { %4762 = vmatprep.mubr.msk.f32.mxu0 %vm487_vm0, %v912_v35  ;;  %v942_v35 = vmul.f32 %v863_v28, %v5555_v39 }
  0x7f   : > { %4763 = vmatmul.mubr.msk.f32.gmra.mxu0 %vm487_vm0, %v913_v40  ;;  %v943_v40 = vmul.f32 %v863_v28, %v5565_v41 }
  0x80   : > { %4765 = vmatprep.mubr.msk.f32.mxu0 %vm487_vm0, %v914_v42  ;;  %v944_v42 = vmul.f32 %v867_v37, %v5529_v31 }
  0x83   : > { %4766 = vmatmul.mubr.msk.f32.gmra.mxu0 %vm487_vm0, %v915_v46  ;;  %v947_v46 = vmul.f32 %v867_v37, %v5565_v41  ;;  %v4446_v41 = vld [vmem:[%s6587_s4] ss:$0 sm:$0xff] }
  0x84   : > { %4768 = vmatprep.mubr.msk.f32.mxu0 %vm487_vm0, %v916_v47 }
  0x87   : > { %4769 = vmatmul.mubr.msk.f32.gmra.mxu0 %vm487_vm0, %v917_v49 }
  0x88   : > { %4771 = vmatprep.mubr.msk.f32.mxu0 %vm487_vm0, %v918_v50 }
  0x8b   : > { %4772 = vmatmul.mubr.msk.f32.gmra.mxu0 %vm487_vm0, %v919_v52 }
  0x8c   : > { %4774 = vmatprep.mubr.msk.f32.mxu0 %vm487_vm0, %v920_v53 }
  0x8f   : > { %4775 = vmatmul.mubr.msk.f32.gmra.mxu0 %vm487_vm0, %v921_v55 }
  0x90   : > { %4777 = vmatprep.mubr.msk.f32.mxu0 %vm487_vm0, %v922_v56 }
  0x93   : > { %4778 = vmatmul.mubr.msk.f32.gmra.mxu0 %vm487_vm0, %v923_v58 }
  0x94   : > { %4780 = vmatprep.mubr.msk.f32.mxu0 %vm487_vm0, %v924_v60 }
  0x97   : > { %4781 = vmatmul.mubr.msk.f32.gmra.mxu0 %vm487_vm0, %v925_v62 }
  0x98   : > { %4783 = vmatprep.mubr.msk.f32.mxu0 %vm487_vm0, %v926_v63  ;;  %v1633_v63 = vsub.s32 1, %v5441_v5 }
  0x9b   : > { %4784 = vmatmul.mubr.msk.f32.gmra.mxu0 %vm487_vm0, %v927_v36  ;;  %v5784_v36 = vld [vmem:[#allocation3] sm:$0xff] }
  0x9c   : > { %4786 = vmatprep.mubr.msk.f32.mxu0 %vm487_vm0, %v928_v2  ;;  %4835 = vmatprep.mubr.msk.f32.mxu1 %vm487_vm0, %v5784_v36 }
  0x9f   : > { %4787 = vmatmul.mubr.msk.f32.gmra.mxu0 %vm487_vm0, %v929_v4 }
  0xa0   : > { %4789 = vmatprep.mubr.msk.f32.mxu0 %vm487_vm0, %v930_v8 }
  0xa3   : > { %4790 = vmatmul.mubr.msk.f32.gmra.mxu0 %vm487_vm0, %v931_v13 }
  0xa4   : > { %4792 = vmatprep.mubr.msk.f32.mxu0 %vm487_vm0, %v932_v14 }
  0xa7   : > { %4793 = vmatmul.mubr.msk.f32.gmra.mxu0 %vm487_vm0, %v933_v17 }
  0xa8   : > { %4795 = vmatprep.mubr.msk.f32.mxu0 %vm487_vm0, %v934_v18 }
  0xab   : > { %4796 = vmatmul.mubr.msk.f32.gmra.mxu0 %vm487_vm0, %v935_v20  ;;  %v1709_v20 = vsub.s32 5, %v5441_v5 }
  0xac   : > { %4798 = vmatprep.mubr.msk.f32.mxu0 %vm487_vm0, %v936_v21 }
  0xaf   : > { %4799 = vmatmul.mubr.msk.f32.gmra.mxu0 %vm487_vm0, %v937_v16 }
  0xb0   : > { %4801 = vmatprep.mubr.msk.f32.mxu0 %vm487_vm0, %v938_v24  ;;  %v1728_v24 = vsub.s32 6, %v5441_v5 }
  0xb3   : > { %4802 = vmatmul.mubr.msk.f32.gmra.mxu0 %vm487_vm0, %v939_v29 }
  0xb4   : > { %4804 = vmatprep.mubr.msk.f32.mxu0 %vm487_vm0, %v940_v30 }
  0xb7   : > { %4805 = vmatmul.mubr.msk.f32.gmra.mxu0 %vm487_vm0, %v941_v33 }
  0xb8   : > { %4807 = vmatprep.mubr.msk.f32.mxu0 %vm487_vm0, %v942_v35 }
  0xbb   : > { %4808 = vmatmul.mubr.msk.f32.gmra.mxu0 %vm487_vm0, %v943_v40 }
  0xbc   : > { %4810 = vmatprep.mubr.msk.f32.mxu0 %vm487_vm0, %v944_v42 }
  0xbf   : > { %4811 = vmatmul.mubr.msk.f32.gmra.mxu0 %vm487_vm0, %v945_v43 }
  0xc0   : > { %4813 = vmatprep.mubr.msk.f32.mxu0 %vm487_vm0, %v946_v44 }
  0xc3   : > { %4814 = vmatmul.mubr.msk.f32.gmra.mxu0 %vm487_vm0, %v947_v46 }
  0xc4   : > { %4989 = vmatprep.mubr.msk.f32.mxu0 %vm487_vm0, %v5784_v36 }
  0xfc   : > { %v5737_v47 = vpop.f32.mrf.mxu1 }
  0xfe   : > { %v5739_v48 = vpop.f32.mrf.mxu0  ;;  %v5741_v31 = vpop.f32.mrf.mxu1 }
  0xff   : > { %6617 = vst [vmem:[#allocation19_spill] sm:$0xff] %v5739_v48 }
 0x100   : > { %v5743_v49 = vpop.f32.mrf.mxu0  ;;  %v5745_v38 = vpop.f32.mrf.mxu1 }
 0x101   : > { %6618 = vst [vmem:[#allocation20_spill] sm:$0xff] %v5743_v49 }
 0x102   : > { %v5749_v39 = vpop.f32.mrf.mxu1 }
 0x107   : > { %v5747_v50 = vpop.f32.mrf.mxu0 }
 0x109   : > { %v5754_v51 = vpop.f32.mrf.mxu0 }
 0x10b   : > { %v5756_v53 = vpop.f32.mrf.mxu0 }
 0x10c   : > { %v4826_v52 = vpop.f32.mrf.mxu1 }
 0x10d   : > { %v5758_v54 = vadd.f32 %v4826_v52, %v4446_v41  ;;  %v5760_v56 = vpop.f32.mrf.mxu0 }
 0x10e   : > { %v1603_v55 = vpop.f32.mrf.mxu1 }
 0x10f   : > { %v5762_v57 = vadd.f32 %v4446_v41, %v1603_v55  ;;  %v5766_v58 = vrot.slane %v5758_v54, %v5505_v25  ;;  %v5768_v59 = vpop.f32.mrf.mxu0  ;;  %v1786_v43 = vrot.slane %v5758_v54, %v1633_v63 }
 0x111   : > { %1777 = vbcast.lane.b32.xlu1 %v5766_v58, 272  ;;  %1781 = vbcast.lane.b32.xlu0 %v5766_v58, 280  ;;  %v5772_v60 = vpop.f32.mrf.mxu0  ;;  %v1615_v61 = vrot.slane %v5762_v57, %v5505_v25  ;;  %v1634_v1 = vrot.slane %v5762_v57, %v1633_v63  ;;  %v1652_v25 = vsub.s32 2, %v5441_v5  ;;  %v1672_v13 = vrot.slane %v5762_v57, %v1671_v9 }
 0x112   : > { %v1691_v18 = vrot.slane %v5762_v57, %v1690_v15  ;;  %v1710_v22 = vrot.slane %v5762_v57, %v1709_v20  ;;  %v1729_v29 = vrot.slane %v5762_v57, %v1728_v24  ;;  %v1748_v35 = vrot.slane %v5762_v57, %v1747_v32 }
 0x113   : > { %v5776_v62 = vpop.f32.mrf.mxu0  ;;  %v1653_v4 = vrot.slane %v5762_v57, %v1652_v25  ;;  %v1805_v41 = vrot.slane %v5758_v54, %v1652_v25  ;;  %v1824_v57 = vrot.slane %v5758_v54, %v1671_v9  ;;  %v1843_v63 = vrot.slane %v5758_v54, %v1690_v15 }
 0x114   : > { %v1900_v15 = vrot.slane %v5758_v54, %v1747_v32 }
 0x115   : > { %1621 = vbcast.lane.b32.xlu1 %v1615_v61, 264  ;;  %1629 = vbcast.lane.b32.xlu0 %v1615_v61, 280  ;;  %v5779_v0 = vpop.f32.mrf.mxu0 }
 0x117   : > { %v5786_v2 = vpop.f32.mrf.mxu0 }
 0x119   : > { %1617 = vbcast.lane.b32.xlu1 %v1615_v61, 256  ;;  %1625 = vbcast.lane.b32.xlu0 %v1615_v61, 272  ;;  %v5793_v3 = vpop.f32.mrf.mxu0 }
 0x11b   : > { %v5796_v8 = vpop.f32.mrf.mxu0 }
 0x11d   : > { %1644 = vbcast.lane.b32.xlu1 %v1634_v1, 272  ;;  %1648 = vbcast.lane.b32.xlu0 %v1634_v1, 280  ;;  %v5799_v10 = vpop.f32.mrf.mxu0 }
 0x11f   : > { %v5802_v14 = vpop.f32.mrf.mxu0 }
 0x121   : > { %1636 = vbcast.lane.b32.xlu1 %v1634_v1, 256  ;;  %1640 = vbcast.lane.b32.xlu0 %v1634_v1, 264  ;;  %v5805_v17 = vpop.f32.mrf.mxu0 }
 0x123   : > { %v5808_v19 = vpop.f32.mrf.mxu0 }
 0x125   : > { %1663 = vbcast.lane.b32.xlu1 %v1653_v4, 272  ;;  %1667 = vbcast.lane.b32.xlu0 %v1653_v4, 280  ;;  %v5811_v21 = vpop.f32.mrf.mxu0 }
 0x127   : > { %v5814_v16 = vpop.f32.mrf.mxu0 }
 0x129   : > { %1655 = vbcast.lane.b32.xlu1 %v1653_v4, 256  ;;  %1659 = vbcast.lane.b32.xlu0 %v1653_v4, 264  ;;  %v5817_v28 = vpop.f32.mrf.mxu0  ;;  %v1862_v4 = vrot.slane %v5758_v54, %v1709_v20 }
 0x12b   : > { %v5820_v30 = vpop.f32.mrf.mxu0 }
 0x12d   : > { %1682 = vbcast.lane.b32.xlu1 %v1672_v13, 272  ;;  %1686 = vbcast.lane.b32.xlu0 %v1672_v13, 280  ;;  %v5823_v33 = vpop.f32.mrf.mxu0 }
 0x12f   : > { %v5826_v37 = vpop.f32.mrf.mxu0 }
 0x131   : > { %1674 = vbcast.lane.b32.xlu1 %v1672_v13, 256  ;;  %1678 = vbcast.lane.b32.xlu0 %v1672_v13, 264  ;;  %v5829_v40 = vpop.f32.mrf.mxu0  ;;  %v5299_v13 = vmov 0  }
 0x132   : > { %5081 = vset.pattern.permute.xlu0 %v5299_v13 }
 0x133   : > { %v5832_v42 = vpop.f32.mrf.mxu0 }
 0x135   : > { %1701 = vbcast.lane.b32.xlu1 %v1691_v18, 272  ;;  %1705 = vbcast.lane.b32.xlu0 %v1691_v18, 280  ;;  %v5837_v44 = vpop.f32.mrf.mxu0 }
 0x137   : > { %v5839_v46 = vpop.f32.mrf.mxu0 }
 0x139   : > { %1693 = vbcast.lane.b32.xlu1 %v1691_v18, 256  ;;  %1697 = vbcast.lane.b32.xlu0 %v1691_v18, 264  ;;  %v5842_v52 = vpop.f32.mrf.mxu0 }
 0x13b   : > { %v5844_v55 = vpop.f32.mrf.mxu0 }
 0x13d   : > { %1720 = vbcast.lane.b32.xlu1 %v1710_v22, 272  ;;  %1724 = vbcast.lane.b32.xlu0 %v1710_v22, 280 }
 0x141   : > { %1712 = vbcast.lane.b32.xlu1 %v1710_v22, 256  ;;  %1716 = vbcast.lane.b32.xlu0 %v1710_v22, 264  ;;  %v1881_v22 = vrot.slane %v5758_v54, %v1728_v24 }
 0x145   : > { %1739 = vbcast.lane.b32.xlu1 %v1729_v29, 272  ;;  %1743 = vbcast.lane.b32.xlu0 %v1729_v29, 280 }
 0x149   : > { %1731 = vbcast.lane.b32.xlu1 %v1729_v29, 256  ;;  %1735 = vbcast.lane.b32.xlu0 %v1729_v29, 264 }
 0x14d   : > { %1758 = vbcast.lane.b32.xlu1 %v1748_v35, 272  ;;  %1762 = vbcast.lane.b32.xlu0 %v1748_v35, 280 }
 0x151   : > { %1769 = vbcast.lane.b32.xlu1 %v5766_v58, 256  ;;  %1754 = vbcast.lane.b32.xlu0 %v1748_v35, 264 }
 0x155   : > { %1750 = vbcast.lane.b32.xlu1 %v1748_v35, 256  ;;  %1773 = vbcast.lane.b32.xlu0 %v5766_v58, 264  ;;  %v5847_v58 = vpop.f32.mrf.mxu0 }
 0x157   : > { %v5849_v61 = vpop.f32.mrf.mxu0 }
 0x159   : > { %1796 = vbcast.lane.b32.xlu1 %v1786_v43, 272  ;;  %1800 = vbcast.lane.b32.xlu0 %v1786_v43, 280  ;;  %v5852_v1 = vpop.f32.mrf.mxu0 }
 0x15b   : > { %v5854_v25 = vpop.f32.mrf.mxu0 }
 0x15d   : > { %1788 = vbcast.lane.b32.xlu1 %v1786_v43, 256  ;;  %1792 = vbcast.lane.b32.xlu0 %v1786_v43, 264  ;;  %v5857_v9 = vpop.f32.mrf.mxu0 }
 0x15f   : > { %v5859_v18 = vpop.f32.mrf.mxu0 }
 0x161   : > { %1815 = vbcast.lane.b32.xlu1 %v1805_v41, 272  ;;  %1819 = vbcast.lane.b32.xlu0 %v1805_v41, 280  ;;  %v5863_v29 = vpop.f32.mrf.mxu0 }
 0x163   : > { %v5869_v43 = vpop.f32.mrf.mxu0 }
 0x165   : > { %1807 = vbcast.lane.b32.xlu1 %v1805_v41, 256  ;;  %1811 = vbcast.lane.b32.xlu0 %v1805_v41, 264  ;;  %v5873_v54 = vpop.f32.mrf.mxu0 }
 0x169   : > { %1834 = vbcast.lane.b32.xlu1 %v1824_v57, 272  ;;  %1838 = vbcast.lane.b32.xlu0 %v1824_v57, 280 }
 0x16d   : > { %1826 = vbcast.lane.b32.xlu1 %v1824_v57, 256  ;;  %1830 = vbcast.lane.b32.xlu0 %v1824_v57, 264 }
 0x171   : > { %1853 = vbcast.lane.b32.xlu1 %v1843_v63, 272  ;;  %1857 = vbcast.lane.b32.xlu0 %v1843_v63, 280 }
 0x175   : > { %1845 = vbcast.lane.b32.xlu1 %v1843_v63, 256  ;;  %1849 = vbcast.lane.b32.xlu0 %v1843_v63, 264 }
 0x179   : > { %1872 = vbcast.lane.b32.xlu1 %v1862_v4, 272  ;;  %1876 = vbcast.lane.b32.xlu0 %v1862_v4, 280 }
 0x17d   : > { %1864 = vbcast.lane.b32.xlu1 %v1862_v4, 256  ;;  %1868 = vbcast.lane.b32.xlu0 %v1862_v4, 264 }
 0x181   : > { %1914 = vbcast.lane.b32.xlu1 %v1900_v15, 280  ;;  %1895 = vbcast.lane.b32.xlu0 %v1881_v22, 280 }
 0x183   : > { %v5865_v35 = vpop.permute.xlu1 %1777  ;;  %v5867_v20 = vpop.permute.xlu0 %1781 }
 0x185   : > { %1910 = vbcast.lane.b32.xlu1 %v1900_v15, 272  ;;  %1891 = vbcast.lane.b32.xlu0 %v1881_v22, 272 }
 0x187   : > { %v1622_v41 = vpop.permute.xlu1 %1621  ;;  %v1630_v57 = vpop.permute.xlu0 %1629 }
 0x188   : > { %v1917_v63 = vadd.f32 %v5737_v47, %v1622_v41  ;;  %v1919_v32 = vadd.f32 %v5745_v38, %v1630_v57  ;;  %v5879_v41 = vpop.f32.mrf.mxu0 }
 0x189   : > { %1906 = vbcast.lane.b32.xlu1 %v1900_v15, 264  ;;  %1887 = vbcast.lane.b32.xlu0 %v1881_v22, 264 }
 0x18a   : > { %v1983_v24 = vadd.f32 %v5756_v53, %v1919_v32  ;;  %v1981_v48 = vadd.f32 %v5747_v50, %v1917_v63  ;;  %v4453_v53 = vld [vmem:[%s6589_s6] ss:$0 sm:$0xff] }
 0x18b   : > { %v1618_v4 = vpop.permute.xlu1 %1617  ;;  %v1626_v13 = vpop.permute.xlu0 %1625 }
 0x18c   : > { %v2047_v49 = vmul.f32 0.01, %v1983_v24  ;;  %v1916_v45 = vadd.f32 %v1618_v4, %v5741_v31  ;;  %v1918_v6 = vadd.f32 %v1626_v13, %v5749_v39  ;;  %v2045_v63 = vmul.f32 0.01, %v1981_v48 }
 0x18d   : > { %1902 = vbcast.lane.b32.xlu1 %v1900_v15, 256  ;;  %1883 = vbcast.lane.b32.xlu0 %v1881_v22, 256  ;;  %v5888_v22 = vpop.f32.mrf.mxu0 }
 0x18e   : > { %v1980_v57 = vadd.f32 %v1916_v45, %v5754_v51  ;;  %v1982_v23 = vadd.f32 %v1918_v6, %v5760_v56  ;;  %v2111_v34 = vmax.f32 %v1983_v24, %v2047_v49  ;;  %v4486_v56 = vld [vmem:[%s6590_s7] ss:$0 sm:$0xff]  ;;  %v2109_v12 = vmax.f32 %v1981_v48, %v2045_v63 }
 0x18f   : > { %v1645_v32 = vpop.permute.xlu1 %1644  ;;  %v1649_v50 = vpop.permute.xlu0 %1648 }
 0x190   : > { %v2046_v11 = vmul.f32 0.01, %v1982_v23  ;;  %v1922_v4 = vadd.f32 %v1645_v32, %v5749_v39  ;;  %v1923_v15 = vadd.f32 %v5745_v38, %v1649_v50  ;;  %4827 = vmatprep.subr.mxu1 %v2111_v34  ;;  %v2044_v45 = vmul.f32 0.01, %v1980_v57  ;;  %v5897_v7 = vpop.f32.mrf.mxu0 }
 0x191   : > { %4828 = vmatpush3.msra.mxu1 %v2111_v34  ;;  %2184 = vbcast.lane.b32.xlu1 %v4453_v53, 264 }
 0x192   : > { %v1986_v6 = vadd.f32 %v1922_v4, %v5779_v0  ;;  %v1987_v49 = vadd.f32 %v5776_v62, %v1923_v15  ;;  %v2110_v51 = vmax.f32 %v1982_v23, %v2046_v11  ;;  %2180 = vbcast.lane.b32.xlu0 %v4453_v53, 256  ;;  %v2108_v0 = vmax.f32 %v1980_v57, %v2044_v45  ;;  %v5901_v15 = vld [vmem:[#allocation3 + $0x8] sm:$0xff] }
 0x193   : > { %v1637_v24 = vpop.permute.xlu1 %1636  ;;  %v1641_v13 = vpop.permute.xlu0 %1640 }
 0x194   : > { %v2051_v32 = vmul.f32 0.01, %v1987_v49  ;;  %v1920_v50 = vadd.f32 %v1637_v24, %v5741_v31  ;;  %v1921_v34 = vadd.f32 %v5737_v47, %v1641_v13  ;;  %4829 = vmatprep.subr.mxu1 %v2110_v51  ;;  %v2050_v62 = vmul.f32 0.01, %v1986_v6  ;;  %v5905_v13 = vpop.f32.mrf.mxu0 }
 0x195   : > { %4830 = vmatpush3.msra.mxu1 %v2110_v51  ;;  %3466 = vbcast.lane.b32.xlu1 %v4486_v56, 264 }
 0x196   : > { %v1984_v11 = vadd.f32 %v1920_v50, %v5772_v60  ;;  %v1985_v23 = vadd.f32 %v5768_v59, %v1921_v34  ;;  %4831 = vmatprep.subr.mxu1 %v2109_v12  ;;  %3462 = vbcast.lane.b32.xlu0 %v4486_v56, 256  ;;  %v2115_v51 = vmax.f32 %v1987_v49, %v2051_v32  ;;  %v4487_v60 = vld [vmem:[#allocation2] ss:$0 sm:$0xff] }
 0x197   : > { %v1664_v53 = vpop.permute.xlu1 %1663  ;;  %v1668_v4 = vpop.permute.xlu0 %1667  ;;  %4832 = vmatpush3.msra.mxu1 %v2109_v12  ;;  %v2114_v12 = vmax.f32 %v1986_v6, %v2050_v62 }
 0x198   : > { %v2049_v24 = vmul.f32 0.01, %v1985_v23  ;;  %v1926_v48 = vadd.f32 %v1664_v53, %v5749_v39  ;;  %v1927_v63 = vadd.f32 %v5745_v38, %v1668_v4  ;;  %4833 = vmatprep.subr.mxu1 %v2108_v0  ;;  %v2048_v59 = vmul.f32 0.01, %v1984_v11 }
 0x199   : > { %4834 = vmatpush3.msra.mxu1 %v2108_v0 }
 0x19a   : > { %v1990_v57 = vadd.f32 %v1926_v48, %v5799_v10  ;;  %v1991_v45 = vadd.f32 %v5796_v8, %v1927_v63  ;;  %4838 = vmatprep.subr.mxu1 %v2115_v51  ;;  %4836 = vmatmul.mubr.msk.f32.vlgmr.msra.gmra.mxu1 %vm487_vm0, %v5901_v15  ;;  %v2113_v10 = vmax.f32 %v1985_v23, %v2049_v24  ;;  %v5915_v8 = vpop.f32.mrf.mxu0 }
 0x19b   : > { %v1656_v56 = vpop.permute.xlu1 %1655  ;;  %v1660_v50 = vpop.permute.xlu0 %1659  ;;  %4839 = vmatpush3.msra.mxu1 %v2115_v51  ;;  %4846 = vmatprep.mubr.msk.f32.mxu1 %vm487_vm0, %v5784_v36  ;;  %v2112_v53 = vmax.f32 %v1984_v11, %v2048_v59 }
 0x19c   : > { %v2055_v49 = vmul.f32 0.01, %v1991_v45  ;;  %v1924_v32 = vadd.f32 %v1656_v56, %v5741_v31  ;;  %v1925_v34 = vadd.f32 %v5737_v47, %v1660_v50  ;;  %4840 = vmatprep.subr.mxu1 %v2114_v12  ;;  %3651 = vperm.xlu0 %5081, %v4487_v60   ;;  %v2054_v0 = vmul.f32 0.01, %v1990_v57  ;;  %v5921_v24 = vpop.f32.mrf.mxu0 }
 0x19d   : > { %4841 = vmatpush3.msra.mxu1 %v2114_v12 }
 0x19e   : > { %v1988_v6 = vadd.f32 %v1924_v32, %v5793_v3  ;;  %v1989_v62 = vadd.f32 %v5786_v2, %v1925_v34  ;;  %4842 = vmatprep.subr.mxu1 %v2113_v10  ;;  %v2119_v23 = vmax.f32 %v1991_v45, %v2055_v49  ;;  %v2118_v11 = vmax.f32 %v1990_v57, %v2054_v0 }
 0x19f   : > { %v1683_v4 = vpop.permute.xlu1 %1682  ;;  %v1687_v48 = vpop.permute.xlu0 %1686  ;;  %4843 = vmatpush3.msra.mxu1 %v2113_v10 }
 0x1a0   : > { %v2053_v63 = vmul.f32 0.01, %v1989_v62  ;;  %v1930_v51 = vadd.f32 %v1683_v4, %v5749_v39  ;;  %v1931_v56 = vadd.f32 %v5745_v38, %v1687_v48  ;;  %4844 = vmatprep.subr.mxu1 %v2112_v53  ;;  %v2052_v60 = vmul.f32 0.01, %v1988_v6 }
 0x1a1   : > { %4845 = vmatpush3.msra.mxu1 %v2112_v53 }
 0x1a2   : > { %v1994_v3 = vadd.f32 %v1930_v51, %v5811_v21  ;;  %v1995_v2 = vadd.f32 %v5808_v19, %v1931_v56  ;;  %4849 = vmatprep.subr.mxu1 %v2119_v23  ;;  %4847 = vmatmul.mubr.msk.f32.vlgmr.msra.gmra.mxu1 %vm487_vm0, %v5901_v15  ;;  %v2117_v21 = vmax.f32 %v1989_v62, %v2053_v63  ;;  %v5931_v19 = vpop.f32.mrf.mxu0 }
 0x1a3   : > { %v1675_v59 = vpop.permute.xlu1 %1674  ;;  %v1679_v12 = vpop.permute.xlu0 %1678  ;;  %4850 = vmatpush3.msra.mxu1 %v2119_v23  ;;  %4857 = vmatprep.mubr.msk.f32.mxu1 %vm487_vm0, %v5784_v36  ;;  %v2116_v10 = vmax.f32 %v1988_v6, %v2052_v60 }
 0x1a4   : > { %v2059_v45 = vmul.f32 0.01, %v1995_v2  ;;  %v1928_v50 = vadd.f32 %v1675_v59, %v5741_v31  ;;  %v1929_v49 = vadd.f32 %v5737_v47, %v1679_v12  ;;  %4851 = vmatprep.subr.mxu1 %v2118_v11  ;;  %v2058_v32 = vmul.f32 0.01, %v1994_v3  ;;  %v5937_v63 = vpop.f32.mrf.mxu0 }
 0x1a5   : > { %4852 = vmatpush3.msra.mxu1 %v2118_v11 }
 0x1a6   : > { %v1992_v34 = vadd.f32 %v1928_v50, %v5805_v17  ;;  %v1993_v57 = vadd.f32 %v5802_v14, %v1929_v49  ;;  %4853 = vmatprep.subr.mxu1 %v2117_v21  ;;  %v2123_v62 = vmax.f32 %v1995_v2, %v2059_v45  ;;  %v2122_v6 = vmax.f32 %v1994_v3, %v2058_v32 }
 0x1a7   : > { %v1702_v0 = vpop.permute.xlu1 %1701  ;;  %v1706_v53 = vpop.permute.xlu0 %1705  ;;  %4854 = vmatpush3.msra.mxu1 %v2117_v21 }
 0x1a8   : > { %v2057_v4 = vmul.f32 0.01, %v1993_v57  ;;  %v1934_v48 = vadd.f32 %v1702_v0, %v5749_v39  ;;  %v1935_v51 = vadd.f32 %v5745_v38, %v1706_v53  ;;  %4855 = vmatprep.subr.mxu1 %v2116_v10  ;;  %v2056_v56 = vmul.f32 0.01, %v1992_v34 }
 0x1a9   : > { %4856 = vmatpush3.msra.mxu1 %v2116_v10 }
 0x1aa   : > { %v1998_v17 = vadd.f32 %v1934_v48, %v5823_v33  ;;  %v1999_v14 = vadd.f32 %v5820_v30, %v1935_v51  ;;  %4860 = vmatprep.subr.mxu1 %v2123_v62  ;;  %4858 = vmatmul.mubr.msk.f32.vlgmr.msra.gmra.mxu1 %vm487_vm0, %v5901_v15  ;;  %v2121_v33 = vmax.f32 %v1993_v57, %v2057_v4  ;;  %v5947_v30 = vpop.f32.mrf.mxu0 }
 0x1ab   : > { %v1694_v23 = vpop.permute.xlu1 %1693  ;;  %v1698_v60 = vpop.permute.xlu0 %1697  ;;  %4861 = vmatpush3.msra.mxu1 %v2123_v62  ;;  %4868 = vmatprep.mubr.msk.f32.mxu1 %vm487_vm0, %v5784_v36  ;;  %v2120_v50 = vmax.f32 %v1992_v34, %v2056_v56 }
 0x1ac   : > { %v2063_v2 = vmul.f32 0.01, %v1999_v14  ;;  %v1932_v11 = vadd.f32 %v1694_v23, %v5741_v31  ;;  %v1933_v59 = vadd.f32 %v5737_v47, %v1698_v60  ;;  %4862 = vmatprep.subr.mxu1 %v2122_v6  ;;  %v2062_v12 = vmul.f32 0.01, %v1998_v17  ;;  %v5953_v53 = vpop.f32.mrf.mxu0 }
 0x1ad   : > { %4863 = vmatpush3.msra.mxu1 %v2122_v6 }
 0x1ae   : > { %v1996_v45 = vadd.f32 %v1932_v11, %v5817_v28  ;;  %v1997_v3 = vadd.f32 %v5814_v16, %v1933_v59  ;;  %4864 = vmatprep.subr.mxu1 %v2121_v33  ;;  %v2127_v57 = vmax.f32 %v1999_v14, %v2063_v2  ;;  %v2126_v34 = vmax.f32 %v1998_v17, %v2062_v12 }
 0x1af   : > { %v1721_v49 = vpop.permute.xlu1 %1720  ;;  %v1725_v21 = vpop.permute.xlu0 %1724  ;;  %4865 = vmatpush3.msra.mxu1 %v2121_v33 }
 0x1b0   : > { %v2061_v32 = vmul.f32 0.01, %v1997_v3  ;;  %v1938_v10 = vadd.f32 %v1721_v49, %v5749_v39  ;;  %v1939_v0 = vadd.f32 %v5745_v38, %v1725_v21  ;;  %4866 = vmatprep.subr.mxu1 %v2120_v50  ;;  %v2060_v4 = vmul.f32 0.01, %v1996_v45 }
 0x1b1   : > { %4867 = vmatpush3.msra.mxu1 %v2120_v50 }
 0x1b2   : > { %v2002_v28 = vadd.f32 %v1938_v10, %v5837_v44  ;;  %v2003_v16 = vadd.f32 %v5832_v42, %v1939_v0  ;;  %4871 = vmatprep.subr.mxu1 %v2127_v57  ;;  %4869 = vmatmul.mubr.msk.f32.vlgmr.msra.gmra.mxu1 %vm487_vm0, %v5901_v15  ;;  %v2125_v44 = vmax.f32 %v1997_v3, %v2061_v32  ;;  %v5963_v42 = vpop.f32.mrf.mxu0 }
 0x1b3   : > { %v1713_v48 = vpop.permute.xlu1 %1712  ;;  %v1717_v51 = vpop.permute.xlu0 %1716  ;;  %4872 = vmatpush3.msra.mxu1 %v2127_v57  ;;  %4879 = vmatprep.mubr.msk.f32.mxu1 %vm487_vm0, %v5784_v36  ;;  %v2124_v60 = vmax.f32 %v1996_v45, %v2060_v4 }
 0x1b4   : > { %v2067_v62 = vmul.f32 0.01, %v2003_v16  ;;  %v1936_v56 = vadd.f32 %v1713_v48, %v5741_v31  ;;  %v1937_v14 = vadd.f32 %v5737_v47, %v1717_v51  ;;  %4873 = vmatprep.subr.mxu1 %v2126_v34  ;;  %v2066_v6 = vmul.f32 0.01, %v2002_v28  ;;  %v5969_v50 = vpop.f32.mrf.mxu0 }
 0x1b5   : > { %4874 = vmatpush3.msra.mxu1 %v2126_v34 }
 0x1b6   : > { %v2000_v23 = vadd.f32 %v1936_v56, %v5829_v40  ;;  %v2001_v17 = vadd.f32 %v5826_v37, %v1937_v14  ;;  %4875 = vmatprep.subr.mxu1 %v2125_v44  ;;  %v2131_v3 = vmax.f32 %v2003_v16, %v2067_v62  ;;  %v2130_v45 = vmax.f32 %v2002_v28, %v2066_v6 }
 0x1b7   : > { %v1740_v2 = vpop.permute.xlu1 %1739  ;;  %v1744_v11 = vpop.permute.xlu0 %1743  ;;  %4876 = vmatpush3.msra.mxu1 %v2125_v44 }
 0x1b8   : > { %v2065_v59 = vmul.f32 0.01, %v2001_v17  ;;  %v1942_v33 = vadd.f32 %v1740_v2, %v5749_v39  ;;  %v1943_v12 = vadd.f32 %v5745_v38, %v1744_v11  ;;  %4877 = vmatprep.subr.mxu1 %v2124_v60  ;;  %v2064_v49 = vmul.f32 0.01, %v2000_v23 }
 0x1b9   : > { %4878 = vmatpush3.msra.mxu1 %v2124_v60  ;;  %v1951_v60 = vadd.f32 %v5745_v38, %v5867_v20 }
 0x1ba   : > { %v2006_v40 = vadd.f32 %v1942_v33, %v5847_v58  ;;  %v2007_v37 = vadd.f32 %v5844_v55, %v1943_v12  ;;  %4882 = vmatprep.subr.mxu1 %v2131_v3  ;;  %4880 = vmatmul.mubr.msk.f32.vlgmr.msra.gmra.mxu1 %vm487_vm0, %v5901_v15  ;;  %v2129_v58 = vmax.f32 %v2001_v17, %v2065_v59  ;;  %v5979_v55 = vpop.f32.mrf.mxu0 }
 0x1bb   : > { %v1732_v21 = vpop.permute.xlu1 %1731  ;;  %v1736_v32 = vpop.permute.xlu0 %1735  ;;  %4883 = vmatpush3.msra.mxu1 %v2131_v3  ;;  %4890 = vmatprep.mubr.msk.f32.mxu1 %vm487_vm0, %v5784_v36  ;;  %v2128_v34 = vmax.f32 %v2000_v23, %v2064_v49 }
 0x1bc   : > { %v2071_v10 = vmul.f32 0.01, %v2007_v37  ;;  %v1940_v0 = vadd.f32 %v1732_v21, %v5741_v31  ;;  %v1941_v57 = vadd.f32 %v5737_v47, %v1736_v32  ;;  %4884 = vmatprep.subr.mxu1 %v2130_v45  ;;  %v2070_v4 = vmul.f32 0.01, %v2006_v40  ;;  %v5985_v6 = vpop.f32.mrf.mxu0 }
 0x1bd   : > { %4885 = vmatpush3.msra.mxu1 %v2130_v45 }
 0x1be   : > { %v2004_v16 = vadd.f32 %v1940_v0, %v5842_v52  ;;  %v2005_v28 = vadd.f32 %v5839_v46, %v1941_v57  ;;  %4886 = vmatprep.subr.mxu1 %v2129_v58  ;;  %v2135_v44 = vmax.f32 %v2007_v37, %v2071_v10  ;;  %v2134_v23 = vmax.f32 %v2006_v40, %v2070_v4  ;;  %v5998_v12 = vpop.f32.mrf.mxu0 }
 0x1bf   : > { %v1759_v48 = vpop.permute.xlu1 %1758  ;;  %v1763_v51 = vpop.permute.xlu0 %1762  ;;  %4887 = vmatpush3.msra.mxu1 %v2129_v58  ;;  %v2015_v40 = vadd.f32 %v5869_v43, %v1951_v60 }
 0x1c0   : > { %v2069_v62 = vmul.f32 0.01, %v2005_v28  ;;  %v1946_v56 = vadd.f32 %v1759_v48, %v5749_v39  ;;  %v1947_v14 = vadd.f32 %v5745_v38, %v1763_v51  ;;  %4888 = vmatprep.subr.mxu1 %v2128_v34  ;;  %v2068_v17 = vmul.f32 0.01, %v2004_v16  ;;  %v6005_v57 = vpop.f32.mrf.mxu0 }
 0x1c1   : > { %4889 = vmatpush3.msra.mxu1 %v2128_v34  ;;  %v2079_v4 = vmul.f32 0.01, %v2015_v40 }
 0x1c2   : > { %v2010_v52 = vadd.f32 %v1946_v56, %v5857_v9  ;;  %v2011_v46 = vadd.f32 %v5854_v25, %v1947_v14  ;;  %4893 = vmatprep.subr.mxu1 %v2135_v44  ;;  %4891 = vmatmul.mubr.msk.f32.vlgmr.msra.gmra.mxu1 %vm487_vm0, %v5901_v15  ;;  %v2133_v9 = vmax.f32 %v2005_v28, %v2069_v62 }
 0x1c3   : > { %v1770_v2 = vpop.permute.xlu1 %1769  ;;  %v1755_v11 = vpop.permute.xlu0 %1754  ;;  %4894 = vmatpush3.msra.mxu1 %v2135_v44  ;;  %4901 = vmatprep.mubr.msk.f32.mxu1 %vm487_vm0, %v5784_v36  ;;  %v1950_v25 = vadd.f32 %v5865_v35, %v5749_v39  ;;  %v2132_v49 = vmax.f32 %v2004_v16, %v2068_v17 }
 0x1c4   : > { %v2075_v59 = vmul.f32 0.01, %v2011_v46  ;;  %v1945_v33 = vadd.f32 %v5737_v47, %v1755_v11  ;;  %4895 = vmatprep.subr.mxu1 %v2134_v23  ;;  %v2074_v3 = vmul.f32 0.01, %v2010_v52 }
 0x1c5   : > { %4896 = vmatpush3.msra.mxu1 %v2134_v23  ;;  %v2014_v0 = vadd.f32 %v1950_v25, %v5873_v54 }
 0x1c6   : > { %v2009_v20 = vadd.f32 %v5849_v61, %v1945_v33  ;;  %4897 = vmatprep.subr.mxu1 %v2133_v9  ;;  %v2139_v35 = vmax.f32 %v2011_v46, %v2075_v59  ;;  %v1948_v61 = vadd.f32 %v1770_v2, %v5741_v31  ;;  %v2138_v43 = vmax.f32 %v2010_v52, %v2074_v3 }
 0x1c7   : > { %v1751_v37 = vpop.permute.xlu1 %1750  ;;  %v1774_v45 = vpop.permute.xlu0 %1773  ;;  %4898 = vmatpush3.msra.mxu1 %v2133_v9  ;;  %v2078_v62 = vmul.f32 0.01, %v2014_v0  ;;  %v2143_v46 = vmax.f32 %v2015_v40, %v2079_v4 }
 0x1c8   : > { %v2073_v21 = vmul.f32 0.01, %v2009_v20  ;;  %v1944_v32 = vadd.f32 %v1751_v37, %v5741_v31  ;;  %v1949_v10 = vadd.f32 %v5737_v47, %v1774_v45  ;;  %4899 = vmatprep.subr.mxu1 %v2132_v49  ;;  %v2012_v56 = vadd.f32 %v1948_v61, %v5863_v29 }
 0x1c9   : > { %4900 = vmatpush3.msra.mxu1 %v2132_v49  ;;  %v2142_v11 = vmax.f32 %v2014_v0, %v2078_v62 }
 0x1ca   : > { %v2008_v58 = vadd.f32 %v1944_v32, %v5852_v1  ;;  %4904 = vmatprep.subr.mxu1 %v2139_v35  ;;  %4902 = vmatmul.mubr.msk.f32.vlgmr.msra.gmra.mxu1 %vm487_vm0, %v5901_v15  ;;  %v2013_v34 = vadd.f32 %v5859_v18, %v1949_v10  ;;  %v2137_v51 = vmax.f32 %v2009_v20, %v2073_v21  ;;  %v6015_v1 = vpop.f32.mrf.mxu0  ;;  %v2076_v59 = vmul.f32 0.01, %v2012_v56 }
 0x1cb   : > { %v1797_v16 = vpop.permute.xlu1 %1796  ;;  %v1801_v28 = vpop.permute.xlu0 %1800  ;;  %4905 = vmatpush3.msra.mxu1 %v2139_v35  ;;  %4912 = vmatprep.mubr.msk.f32.mxu1 %vm487_vm0, %v5784_v36 }
 0x1cc   : > { %v2072_v54 = vmul.f32 0.01, %v2008_v58  ;;  %v1955_v48 = vadd.f32 %v5745_v38, %v1801_v28  ;;  %4906 = vmatprep.subr.mxu1 %v2138_v43  ;;  %v1954_v14 = vadd.f32 %v1797_v16, %v5749_v39  ;;  %v2077_v23 = vmul.f32 0.01, %v2013_v34  ;;  %v6021_v2 = vpop.f32.mrf.mxu0 }
 0x1cd   : > { %4907 = vmatpush3.msra.mxu1 %v2138_v43  ;;  %v2140_v21 = vmax.f32 %v2012_v56, %v2076_v59 }
 0x1ce   : > { %4908 = vmatprep.subr.mxu1 %v2137_v51  ;;  %v2136_v44 = vmax.f32 %v2008_v58, %v2072_v54  ;;  %v2019_v18 = vadd.f32 %v5897_v7, %v1955_v48  ;;  %v2018_v29 = vadd.f32 %v1954_v14, %v5905_v13  ;;  %v2141_v49 = vmax.f32 %v2013_v34, %v2077_v23  ;;  %v6031_v13 = vpop.f32.mrf.mxu0 }
 0x1cf   : > { %v1789_v17 = vpop.permute.xlu1 %1788  ;;  %v1793_v52 = vpop.permute.xlu0 %1792  ;;  %4909 = vmatpush3.msra.mxu1 %v2137_v51 }
 0x1d0   : > { %v1953_v60 = vadd.f32 %v5737_v47, %v1793_v52  ;;  %4910 = vmatprep.subr.mxu1 %v2136_v44  ;;  %v1952_v33 = vadd.f32 %v1789_v17, %v5741_v31  ;;  %v2083_v7 = vmul.f32 0.01, %v2019_v18  ;;  %v2082_v40 = vmul.f32 0.01, %v2018_v29  ;;  %v6037_v58 = vpop.f32.mrf.mxu0 }
 0x1d1   : > { %4911 = vmatpush3.msra.mxu1 %v2136_v44 }
 0x1d2   : > { %4913 = vmatmul.mubr.msk.f32.vlgmr.msra.gmra.mxu1 %vm487_vm0, %v5901_v15  ;;  %4915 = vmatprep.subr.mxu1 %v2143_v46  ;;  %v2017_v3 = vadd.f32 %v5879_v41, %v1953_v60  ;;  %v2016_v37 = vadd.f32 %v1952_v33, %v5888_v22  ;;  %v2147_v61 = vmax.f32 %v2019_v18, %v2083_v7  ;;  %v6047_v51 = vpop.f32.mrf.mxu0 }
 0x1d3   : > { %v1816_v9 = vpop.permute.xlu1 %1815  ;;  %v1820_v25 = vpop.permute.xlu0 %1819  ;;  %4916 = vmatpush3.msra.mxu1 %v2143_v46  ;;  %4923 = vmatprep.mubr.msk.f32.mxu1 %vm487_vm0, %v5784_v36  ;;  %v2146_v16 = vmax.f32 %v2018_v29, %v2082_v40 }
 0x1d4   : > { %v1959_v20 = vadd.f32 %v5745_v38, %v1820_v25  ;;  %4917 = vmatprep.subr.mxu1 %v2142_v11  ;;  %v1958_v45 = vadd.f32 %v1816_v9, %v5749_v39  ;;  %v2081_v35 = vmul.f32 0.01, %v2017_v3  ;;  %v2080_v43 = vmul.f32 0.01, %v2016_v37  ;;  %v6053_v60 = vpop.f32.mrf.mxu0 }
 0x1d5   : > { %4918 = vmatpush3.msra.mxu1 %v2142_v11 }
 0x1d6   : > { %4919 = vmatprep.subr.mxu1 %v2141_v49  ;;  %v2023_v41 = vadd.f32 %v5931_v19, %v1959_v20  ;;  %v2022_v22 = vadd.f32 %v1958_v45, %v5937_v63  ;;  %v2145_v63 = vmax.f32 %v2017_v3, %v2081_v35  ;;  %v2144_v44 = vmax.f32 %v2016_v37, %v2080_v43  ;;  %v6063_v3 = vpop.f32.mrf.mxu0 }
 0x1d7   : > { %v1808_v32 = vpop.permute.xlu1 %1807  ;;  %v1812_v10 = vpop.permute.xlu0 %1811  ;;  %4920 = vmatpush3.msra.mxu1 %v2141_v49 }
 0x1d8   : > { %v1957_v0 = vadd.f32 %v5737_v47, %v1812_v10  ;;  %4921 = vmatprep.subr.mxu1 %v2140_v21  ;;  %v1956_v4 = vadd.f32 %v1808_v32, %v5741_v31  ;;  %v2087_v19 = vmul.f32 0.01, %v2023_v41  ;;  %v2086_v62 = vmul.f32 0.01, %v2022_v22 }
 0x1d9   : > { %4922 = vmatpush3.msra.mxu1 %v2140_v21 }
 0x1da   : > { %4926 = vmatprep.subr.mxu1 %v2147_v61  ;;  %4924 = vmatmul.mubr.msk.f32.vlgmr.msra.gmra.mxu1 %vm487_vm0, %v5901_v15  ;;  %v2021_v34 = vadd.f32 %v5915_v8, %v1957_v0  ;;  %v2020_v56 = vadd.f32 %v1956_v4, %v5921_v24  ;;  %v2151_v18 = vmax.f32 %v2023_v41, %v2087_v19  ;;  %v6069_v41 = vpop.f32.mrf.mxu0 }
 0x1db   : > { %v1835_v28 = vpop.permute.xlu1 %1834  ;;  %v1839_v54 = vpop.permute.xlu0 %1838  ;;  %4927 = vmatpush3.msra.mxu1 %v2147_v61  ;;  %4934 = vmatprep.mubr.msk.f32.mxu1 %vm487_vm0, %v5784_v36  ;;  %v2150_v29 = vmax.f32 %v2022_v22, %v2086_v62 }
 0x1dc   : > { %v1963_v48 = vadd.f32 %v5745_v38, %v1839_v54  ;;  %4928 = vmatprep.subr.mxu1 %v2146_v16  ;;  %v1962_v14 = vadd.f32 %v1835_v28, %v5749_v39  ;;  %v2085_v46 = vmul.f32 0.01, %v2021_v34  ;;  %v2084_v11 = vmul.f32 0.01, %v2020_v56  ;;  %v6079_v54 = vpop.f32.mrf.mxu0 }
 0x1dd   : > { %4929 = vmatpush3.msra.mxu1 %v2146_v16 }
 0x1de   : > { %4930 = vmatprep.subr.mxu1 %v2145_v63  ;;  %v2027_v8 = vadd.f32 %v5963_v42, %v1963_v48  ;;  %v2026_v24 = vadd.f32 %v1962_v14, %v5969_v50  ;;  %v2149_v50 = vmax.f32 %v2021_v34, %v2085_v46  ;;  %v2148_v37 = vmax.f32 %v2020_v56, %v2084_v11 }
 0x1df   : > { %v1827_v17 = vpop.permute.xlu1 %1826  ;;  %v1831_v52 = vpop.permute.xlu0 %1830  ;;  %4931 = vmatpush3.msra.mxu1 %v2145_v63 }
 0x1e0   : > { %v1961_v23 = vadd.f32 %v5737_v47, %v1831_v52  ;;  %4932 = vmatprep.subr.mxu1 %v2144_v44  ;;  %v1960_v59 = vadd.f32 %v1827_v17, %v5741_v31  ;;  %v2091_v42 = vmul.f32 0.01, %v2027_v8  ;;  %v2090_v20 = vmul.f32 0.01, %v2026_v24  ;;  %v6085_v17 = vpop.f32.mrf.mxu0 }
 0x1e1   : > { %4933 = vmatpush3.msra.mxu1 %v2144_v44 }
 0x1e2   : > { %4937 = vmatprep.subr.mxu1 %v2151_v18  ;;  %4935 = vmatmul.mubr.msk.f32.vlgmr.msra.gmra.mxu1 %vm487_vm0, %v5901_v15  ;;  %v2025_v25 = vadd.f32 %v5947_v30, %v1961_v23  ;;  %v2024_v49 = vadd.f32 %v1960_v59, %v5953_v53  ;;  %v2155_v35 = vmax.f32 %v2027_v8, %v2091_v42 }
 0x1e3   : > { %v1854_v33 = vpop.permute.xlu1 %1853  ;;  %v1858_v9 = vpop.permute.xlu0 %1857  ;;  %4938 = vmatpush3.msra.mxu1 %v2151_v18  ;;  %4945 = vmatprep.mubr.msk.f32.mxu1 %vm487_vm0, %v5784_v36  ;;  %v2154_v43 = vmax.f32 %v2026_v24, %v2090_v20  ;;  %v6092_v24 = vld [vmem:[#allocation3] sm:$0xff] }
 0x1e4   : > { %v1967_v7 = vadd.f32 %v5745_v38, %v1858_v9  ;;  %4939 = vmatprep.subr.mxu1 %v2150_v29  ;;  %v1966_v40 = vadd.f32 %v1854_v33, %v5749_v39  ;;  %v2089_v32 = vmul.f32 0.01, %v2025_v25  ;;  %v2088_v0 = vmul.f32 0.01, %v2024_v49  ;;  %v4815_v33 = vpop.f32.mrf.mxu0 }
 0x1e5   : > { %4940 = vmatpush3.msra.mxu1 %v2150_v29 }
 0x1e6   : > { %4941 = vmatprep.subr.mxu1 %v2149_v50  ;;  %v2031_v30 = vadd.f32 %v5998_v12, %v1967_v7  ;;  %v2030_v53 = vadd.f32 %v1966_v40, %v6005_v57  ;;  %v2153_v57 = vmax.f32 %v2025_v25, %v2089_v32  ;;  %v2152_v63 = vmax.f32 %v2024_v49, %v2088_v0 }
 0x1e7   : > { %v1846_v45 = vpop.permute.xlu1 %1845  ;;  %v1850_v21 = vpop.permute.xlu0 %1849  ;;  %4942 = vmatpush3.msra.mxu1 %v2149_v50 }
 0x1e8   : > { %v1965_v10 = vadd.f32 %v5737_v47, %v1850_v21  ;;  %4943 = vmatprep.subr.mxu1 %v2148_v37  ;;  %v1964_v61 = vadd.f32 %v1846_v45, %v5741_v31  ;;  %v2095_v12 = vmul.f32 0.01, %v2031_v30  ;;  %v2094_v19 = vmul.f32 0.01, %v2030_v53  ;;  %v1516_v21 = vpop.f32.mrf.mxu0 }
 0x1e9   : > { %4944 = vmatpush3.msra.mxu1 %v2148_v37 }
 0x1ea   : > { %4948 = vmatprep.subr.mxu1 %v2155_v35  ;;  %4946 = vmatmul.mubr.msk.f32.vlgmr.msra.gmra.mxu1 %vm487_vm0, %v5901_v15  ;;  %v2029_v16 = vadd.f32 %v5979_v55, %v1965_v10  ;;  %v2028_v34 = vadd.f32 %v1964_v61, %v5985_v6  ;;  %v2159_v44 = vmax.f32 %v2031_v30, %v2095_v12 }
 0x1eb   : > { %v1873_v22 = vpop.permute.xlu1 %1872  ;;  %v1877_v4 = vpop.permute.xlu0 %1876  ;;  %4949 = vmatpush3.msra.mxu1 %v2155_v35  ;;  %4956 = vmatprep.mubr.msk.f32.mxu1 %vm487_vm0, %v5784_v36 }
 0x1ec   : > { %v1971_v28 = vadd.f32 %v5745_v38, %v1877_v4  ;;  %4950 = vmatprep.subr.mxu1 %v2154_v43  ;;  %v1970_v48 = vadd.f32 %v1873_v22, %v5749_v39  ;;  %v2093_v55 = vmul.f32 0.01, %v2029_v16  ;;  %v2092_v52 = vmul.f32 0.01, %v2028_v34 }
 0x1ed   : > { %4951 = vmatpush3.msra.mxu1 %v2154_v43 }
 0x1ee   : > { %4952 = vmatprep.subr.mxu1 %v2153_v57  ;;  %v2035_v62 = vadd.f32 %v6031_v13, %v1971_v28  ;;  %v2034_v6 = vadd.f32 %v1970_v48, %v6037_v58  ;;  %v2158_v13 = vmax.f32 %v2030_v53, %v2094_v19  ;;  %v2157_v29 = vmax.f32 %v2029_v16, %v2093_v55 }
 0x1ef   : > { %v1865_v36 = vpop.permute.xlu1 %1864  ;;  %v1869_v56 = vpop.permute.xlu0 %1868  ;;  %4953 = vmatpush3.msra.mxu1 %v2153_v57  ;;  %v2156_v25 = vmax.f32 %v2028_v34, %v2092_v52 }
 0x1f0   : > { %v1969_v14 = vadd.f32 %v5737_v47, %v1869_v56  ;;  %4954 = vmatprep.subr.mxu1 %v2152_v63  ;;  %v1968_v46 = vadd.f32 %v1865_v36, %v5741_v31  ;;  %v2099_v8 = vmul.f32 0.01, %v2035_v62  ;;  %v2098_v9 = vmul.f32 0.01, %v2034_v6 }
 0x1f1   : > { %4955 = vmatpush3.msra.mxu1 %v2152_v63 }
 0x1f2   : > { %4959 = vmatprep.subr.mxu1 %v2159_v44  ;;  %4957 = vmatmul.mubr.msk.f32.vlgmr.msra.gmra.mxu1 %vm487_vm0, %v5901_v15  ;;  %v2033_v23 = vadd.f32 %v6015_v1, %v1969_v14  ;;  %v2032_v42 = vadd.f32 %v1968_v46, %v6021_v2  ;;  %v2163_v49 = vmax.f32 %v2035_v62, %v2099_v8 }
 0x1f3   : > { %v1915_v18 = vpop.permute.xlu1 %1914  ;;  %v1896_v11 = vpop.permute.xlu0 %1895  ;;  %4960 = vmatpush3.msra.mxu1 %v2159_v44  ;;  %4967 = vmatprep.mubr.msk.f32.mxu1 %vm487_vm0, %v6092_v24 }
 0x1f4   : > { %v1979_v58 = vadd.f32 %v5745_v38, %v1915_v18  ;;  %v1975_v59 = vadd.f32 %v5745_v38, %v1896_v11  ;;  %4961 = vmatprep.subr.mxu1 %v2158_v13  ;;  %v2097_v7 = vmul.f32 0.01, %v2033_v23  ;;  %v2096_v32 = vmul.f32 0.01, %v2032_v42 }
 0x1f5   : > { %4962 = vmatpush3.msra.mxu1 %v2158_v13 }
 0x1f6   : > { %v2039_v1 = vadd.f32 %v6063_v3, %v1975_v59  ;;  %4963 = vmatprep.subr.mxu1 %v2157_v29  ;;  %v2043_v37 = vadd.f32 %v4815_v33, %v1979_v58  ;;  %v2162_v3 = vmax.f32 %v2034_v6, %v2098_v9  ;;  %v2161_v53 = vmax.f32 %v2033_v23, %v2097_v7 }
 0x1f7   : > { %v1911_v50 = vpop.permute.xlu1 %1910  ;;  %v1892_v20 = vpop.permute.xlu0 %1891  ;;  %4964 = vmatpush3.msra.mxu1 %v2157_v29  ;;  %v2160_v12 = vmax.f32 %v2032_v42, %v2096_v32 }
 0x1f8   : > { %v2103_v40 = vmul.f32 0.01, %v2039_v1  ;;  %v1978_v38 = vadd.f32 %v1911_v50, %v5749_v39  ;;  %v1974_v45 = vadd.f32 %v1892_v20, %v5749_v39  ;;  %4965 = vmatprep.subr.mxu1 %v2156_v25  ;;  %v2107_v39 = vmul.f32 0.01, %v2043_v37 }
 0x1f9   : > { %4966 = vmatpush3.msra.mxu1 %v2156_v25 }
 0x1fa   : > { %v2038_v2 = vadd.f32 %v1974_v45, %v6069_v41  ;;  %4970 = vmatprep.subr.mxu1 %v2163_v49  ;;  %4968 = vmatmul.mubr.msk.f32.vlgmr.msra.gmra.mxu1 %vm487_vm0, %v5901_v15  ;;  %v2042_v30 = vadd.f32 %v1978_v38, %v1516_v21  ;;  %v2167_v0 = vmax.f32 %v2039_v1, %v2103_v40 }
 0x1fb   : > { %v1907_v10 = vpop.permute.xlu1 %1906  ;;  %v1888_v35 = vpop.permute.xlu0 %1887  ;;  %4971 = vmatpush3.msra.mxu1 %v2163_v49  ;;  %4978 = vmatprep.mubr.msk.f32.mxu1 %vm487_vm0, %v6092_v24  ;;  %v2171_v34 = vmax.f32 %v2043_v37, %v2107_v39 }
 0x1fc   : > { %v2102_v61 = vmul.f32 0.01, %v2038_v2  ;;  %v1977_v43 = vadd.f32 %v5737_v47, %v1907_v10  ;;  %v1973_v41 = vadd.f32 %v5737_v47, %v1888_v35  ;;  %4972 = vmatprep.subr.mxu1 %v2162_v3  ;;  %4981 = vmatprep.subr.mxu0 %v2167_v0  ;;  %v2106_v16 = vmul.f32 0.01, %v2042_v30 }
 0x1fd   : > { %4973 = vmatpush3.msra.mxu1 %v2162_v3  ;;  %4982 = vmatpush3.msra.mxu0 %v2167_v0 }
 0x1fe   : > { %v2041_v22 = vadd.f32 %v6079_v54, %v1977_v43  ;;  %v2037_v4 = vadd.f32 %v6047_v51, %v1973_v41  ;;  %4974 = vmatprep.subr.mxu1 %v2161_v53  ;;  %v2166_v19 = vmax.f32 %v2038_v2, %v2102_v61  ;;  %v2170_v56 = vmax.f32 %v2042_v30, %v2106_v16 }
 0x1ff   : > { %v1903_v28 = vpop.permute.xlu1 %1902  ;;  %v1884_v57 = vpop.permute.xlu0 %1883  ;;  %4975 = vmatpush3.msra.mxu1 %v2161_v53 }
 0x200   : > { %v2101_v48 = vmul.f32 0.01, %v2037_v4  ;;  %v1976_v63 = vadd.f32 %v1903_v28, %v5741_v31  ;;  %v1972_v47 = vadd.f32 %v1884_v57, %v5741_v31  ;;  %4976 = vmatprep.subr.mxu1 %v2160_v12  ;;  %v2105_v62 = vmul.f32 0.01, %v2041_v22  ;;  %4983 = vmatprep.subr.mxu0 %v2166_v19 }
 0x201   : > { %4977 = vmatpush3.msra.mxu1 %v2160_v12  ;;  %4984 = vmatpush3.msra.mxu0 %v2166_v19 }
 0x202   : > { %v2040_v51 = vadd.f32 %v1976_v63, %v6085_v17  ;;  %v2036_v54 = vadd.f32 %v1972_v47, %v6053_v60  ;;  %4992 = vmatprep.subr.mxu1 %v2171_v34  ;;  %v2165_v36 = vmax.f32 %v2037_v4, %v2101_v48  ;;  %4979 = vmatmul.mubr.msk.f32.vlgmr.msra.gmra.mxu1 %vm487_vm0, %v5901_v15 }
 0x203   : > { %4993 = vmatpush3.msra.mxu1 %v2171_v34  ;;  %v2169_v31 = vmax.f32 %v2041_v22, %v2105_v62  ;;  %5000 = vmatprep.mubr.msk.f32.mxu1 %vm487_vm0, %v6092_v24  ;;  %v6125_v46 = vpop.permute.xlu1 %2184 }
 0x204   : > { %v2104_v55 = vmul.f32 0.01, %v2040_v51  ;;  %v2100_v14 = vmul.f32 0.01, %v2036_v54  ;;  %4985 = vmatprep.subr.mxu0 %v2165_v36  ;;  %4994 = vmatprep.subr.mxu1 %v2170_v56  ;;  %v6123_v6 = vpop.permute.xlu0 %2180 }
 0x205   : > { %4986 = vmatpush3.msra.mxu0 %v2165_v36  ;;  %4995 = vmatpush3.msra.mxu1 %v2170_v56 }
 0x206   : > { %v2164_v44 = vmax.f32 %v2036_v54, %v2100_v14  ;;  %v2168_v52 = vmax.f32 %v2040_v51, %v2104_v55  ;;  %4996 = vmatprep.subr.mxu1 %v2169_v31 }
 0x207   : > { %4997 = vmatpush3.msra.mxu1 %v2169_v31  ;;  %v6131_v42 = vpop.permute.xlu1 %3466 }
 0x208   : > { %4987 = vmatprep.subr.mxu0 %v2164_v44  ;;  %4998 = vmatprep.subr.mxu1 %v2168_v52  ;;  %v6133_v1 = vpop.permute.xlu0 %3462 }
 0x209   : > { %4988 = vmatpush3.msra.mxu0 %v2164_v44  ;;  %4999 = vmatpush3.msra.mxu1 %v2168_v52 }
 0x20a   : > { %4990 = vmatmul.mubr.msk.f32.vlgmr.msra.gmra.mxu0 %vm487_vm0, %v5901_v15  ;;  %5001 = vmatmul.mubr.msk.f32.vlgmr.msra.gmra.mxu1 %vm487_vm0, %v5901_v15 }
 0x25a   : > { %v4837_v60 = vpop.f32.mrf.mxu1 }
 0x25b   : > { %v2264_v8 = vadd.f32 %v4837_v60, %v6125_v46 }
 0x25c   : > { %v2258_v17 = vpop.f32.mrf.mxu1 }
 0x25d   : > { %v2259_v13 = vadd.f32 %v2258_v17, %v6123_v6  ;;  %v3393_v58 = vmul.f32 0.01, %v2264_v8 }
 0x25f   : > { %v3392_v11 = vmul.f32 0.01, %v2259_v13  ;;  %v3425_v25 = vmax.f32 %v2264_v8, %v3393_v58 }
 0x261   : > { %v3424_v33 = vmax.f32 %v2259_v13, %v3392_v11  ;;  %v3469_v45 = vmul.f32 %v6131_v42, %v3425_v25 }
 0x262   : > { %v4848_v23 = vpop.f32.mrf.mxu1 }
 0x263   : > { %v2339_v18 = vadd.f32 %v4848_v23, %v6125_v46  ;;  %v3468_v40 = vmul.f32 %v6133_v1, %v3424_v33  ;;  %v3501_v43 = vsel %vm581_vm1, %v3469_v45, 0.0 }
 0x264   : > { %v2333_v24 = vpop.f32.mrf.mxu1 }
 0x265   : > { %v2334_v59 = vadd.f32 %v2333_v24, %v6123_v6  ;;  %v3395_v29 = vmul.f32 0.01, %v2339_v18  ;;  %v3500_v0 = vsel %vm581_vm1, %v3468_v40, 0.0 }
 0x266   : > { %v3502_v22 = vadd.f32 %v3501_v43, %v3500_v0 }
 0x267   : > { %v3394_v15 = vmul.f32 0.01, %v2334_v59  ;;  %v3427_v9 = vmax.f32 %v2339_v18, %v3395_v29 }
 0x268   : > { %v3503_v63 = vrot.slane %v3502_v22, 4 }
 0x269   : > { %v3426_v7 = vmax.f32 %v2334_v59, %v3394_v15  ;;  %v3471_v50 = vmul.f32 %v6131_v42, %v3427_v9 }
 0x26a   : > { %v4859_v20 = vpop.f32.mrf.mxu1  ;;  %v3504_v31 = vadd.f32 %v3503_v63, %v3502_v22 }
 0x26b   : > { %v2414_v49 = vadd.f32 %v4859_v20, %v6125_v46  ;;  %v3470_v37 = vmul.f32 %v6133_v1, %v3426_v7  ;;  %v3510_v3 = vsel %vm581_vm1, %v3471_v50, 0.0 }
 0x26c   : > { %v2408_v38 = vpop.f32.mrf.mxu1  ;;  %v3505_v58 = vrot.slane %v3504_v31, 2 }
 0x26d   : > { %v2409_v21 = vadd.f32 %v2408_v38, %v6123_v6  ;;  %v3397_v32 = vmul.f32 0.01, %v2414_v49  ;;  %v3509_v2 = vsel %vm581_vm1, %v3470_v37, 0.0 }
 0x26e   : > { %v3511_v30 = vadd.f32 %v3510_v3, %v3509_v2  ;;  %v6160_v3 = vpop.permute.xlu0 %3651 }
 0x26f   : > { %v3396_v10 = vmul.f32 0.01, %v2409_v21  ;;  %v3429_v35 = vmax.f32 %v2414_v49, %v3397_v32  ;;  %v3506_v49 = vadd.f32 %v3505_v58, %v3504_v31 }
 0x270   : > { %v3512_v53 = vrot.slane %v3511_v30, 4 }
 0x271   : > { %v3428_v39 = vmax.f32 %v2409_v21, %v3396_v10  ;;  %v3473_v61 = vmul.f32 %v6131_v42, %v3429_v35 }
 0x272   : > { %v4870_v41 = vpop.f32.mrf.mxu1  ;;  %v3513_v4 = vadd.f32 %v3512_v53, %v3511_v30  ;;  %v3507_v53 = vrot.slane %v3506_v49, 1 }
 0x273   : > { %v2489_v12 = vadd.f32 %v4870_v41, %v6125_v46  ;;  %v3472_v16 = vmul.f32 %v6133_v1, %v3428_v39  ;;  %v3519_v48 = vsel %vm581_vm1, %v3473_v61, 0.0 }
 0x274   : > { %v2483_v28 = vpop.f32.mrf.mxu1  ;;  %v3514_v47 = vrot.slane %v3513_v4, 2 }
 0x275   : > { %v2484_v57 = vadd.f32 %v2483_v28, %v6123_v6  ;;  %v3399_v19 = vmul.f32 0.01, %v2489_v12  ;;  %v3518_v34 = vsel %vm581_vm1, %v3472_v16, 0.0 }
 0x276   : > { %v3520_v62 = vadd.f32 %v3519_v48, %v3518_v34  ;;  %v3515_v44 = vadd.f32 %v3514_v47, %v3513_v4  ;;  %v3508_v34 = vadd.f32 %v3507_v53, %v3506_v49 }
 0x277   : > { %v3398_v51 = vmul.f32 0.01, %v2484_v57  ;;  %v3431_v54 = vmax.f32 %v2489_v12, %v3399_v19 }
 0x278   : > { %v3521_v36 = vrot.slane %v3520_v62, 4  ;;  %v3516_v59 = vrot.slane %v3515_v44, 1 }
 0x279   : > { %v3430_v56 = vmax.f32 %v2484_v57, %v3398_v51  ;;  %v3475_v55 = vmul.f32 %v6131_v42, %v3431_v54 }
 0x27a   : > { %v4881_v14 = vpop.f32.mrf.mxu1  ;;  %v3522_v52 = vadd.f32 %v3521_v36, %v3520_v62  ;;  %v3517_v40 = vadd.f32 %v3516_v59, %v3515_v44 }
 0x27b   : > { %v2564_v60 = vadd.f32 %v4881_v14, %v6125_v46  ;;  %v3474_v17 = vmul.f32 %v6133_v1, %v3430_v56  ;;  %v3528_v24 = vsel %vm581_vm1, %v3475_v55, 0.0 }
 0x27c   : > { %v2558_v13 = vpop.f32.mrf.mxu1  ;;  %v3523_v8 = vrot.slane %v3522_v52, 2  ;;  %v3655_v43 = vadd.f32 %v6160_v3, %v3517_v40 }
 0x27d   : > { %v2559_v23 = vadd.f32 %v2558_v13, %v6123_v6  ;;  %v3401_v18 = vmul.f32 0.01, %v2564_v60  ;;  %v3527_v11 = vsel %vm581_vm1, %v3474_v17, 0.0  ;;  %v3654_v13 = vadd.f32 %v6160_v3, %v3508_v34 }
 0x27e   : > { %v3529_v29 = vadd.f32 %v3528_v24, %v3527_v11  ;;  %v3524_v9 = vadd.f32 %v3523_v8, %v3522_v52  ;;  %v3671_v47 = vsub.f32 0.0, %v3655_v43 }
 0x27f   : > { %v3400_v15 = vmul.f32 0.01, %v2559_v23  ;;  %v3433_v33 = vmax.f32 %v2564_v60, %v3401_v18 }
 0x280   : > { %v3530_v25 = vrot.slane %v3529_v29, 4  ;;  %v3525_v21 = vrot.slane %v3524_v9, 1  ;;  %v3688_v8 = vmul.f32 1.442695, %v3671_v47 }
 0x281   : > { %v3432_v7 = vmax.f32 %v2559_v23, %v3400_v15  ;;  %v3477_v50 = vmul.f32 %v6131_v42, %v3433_v33 }
 0x282   : > { %v4892_v20 = vpop.f32.mrf.mxu1  ;;  %v3531_v37 = vadd.f32 %v3530_v25, %v3529_v29  ;;  %v3526_v4 = vadd.f32 %v3525_v21, %v3524_v9  ;;  %5084 = vpow2.f32 %v3688_v8 }
 0x283   : > { %v2639_v38 = vadd.f32 %v4892_v20, %v6125_v46  ;;  %v3476_v45 = vmul.f32 %v6133_v1, %v3432_v7  ;;  %v3537_v0 = vsel %vm581_vm1, %v3477_v50, 0.0  ;;  %v3670_v7 = vsub.f32 0.0, %v3654_v13 }
 0x284   : > { %v2633_v32 = vpop.f32.mrf.mxu1  ;;  %v3532_v2 = vrot.slane %v3531_v37, 2  ;;  %v3656_v54 = vadd.f32 %v6160_v3, %v3526_v4 }
 0x285   : > { %v2634_v30 = vadd.f32 %v2633_v32, %v6123_v6  ;;  %v3403_v10 = vmul.f32 0.01, %v2639_v38  ;;  %v3536_v35 = vsel %vm581_vm1, %v3476_v45, 0.0 }
 0x286   : > { %v3533_v39 = vadd.f32 %v3532_v2, %v3531_v37  ;;  %v3538_v61 = vadd.f32 %v3537_v0, %v3536_v35  ;;  %v3672_v11 = vsub.f32 0.0, %v3656_v54  ;;  %v3686_v0 = vmul.f32 1.442695, %v3670_v7 }
 0x287   : > { %v3402_v41 = vmul.f32 0.01, %v2634_v30  ;;  %v3435_v22 = vmax.f32 %v2639_v38, %v3403_v10 }
 0x288   : > { %v3534_v12 = vrot.slane %v3533_v39, 1  ;;  %v3539_v16 = vrot.slane %v3538_v61, 4  ;;  %v3690_v49 = vmul.f32 1.442695, %v3672_v11 }
 0x289   : > { %v3434_v28 = vmax.f32 %v2634_v30, %v3402_v41  ;;  %v3479_v57 = vmul.f32 %v6131_v42, %v3435_v22 }
 0x28a   : > { %v4903_v19 = vpop.f32.mrf.mxu1  ;;  %v3535_v48 = vadd.f32 %v3534_v12, %v3533_v39  ;;  %v3540_v63 = vadd.f32 %v3539_v16, %v3538_v61  ;;  %5086 = vpow2.f32 %v3690_v49 }
 0x28b   : > { %v2714_v62 = vadd.f32 %v4903_v19, %v6125_v46  ;;  %v3478_v51 = vmul.f32 %v6133_v1, %v3434_v28  ;;  %v3546_v52 = vsel %vm581_vm1, %v3479_v57, 0.0 }
 0x28c   : > { %v2708_v36 = vpop.f32.mrf.mxu1  ;;  %v3541_v56 = vrot.slane %v3540_v63, 2  ;;  %v3657_v55 = vadd.f32 %v6160_v3, %v3535_v48 }
 0x28d   : > { %v3405_v14 = vmul.f32 0.01, %v2714_v62  ;;  %v2709_v31 = vadd.f32 %v2708_v36, %v6123_v6  ;;  %v3545_v44 = vsel %vm581_vm1, %v3478_v51, 0.0 }
 0x28e   : > { %v3542_v60 = vadd.f32 %v3541_v56, %v3540_v63  ;;  %v3547_v17 = vadd.f32 %v3546_v52, %v3545_v44  ;;  %v3673_v59 = vsub.f32 0.0, %v3657_v55 }
 0x28f   : > { %v3437_v23 = vmax.f32 %v2714_v62, %v3405_v14  ;;  %v3404_v18 = vmul.f32 0.01, %v2709_v31 }
 0x290   : > { %v3543_v24 = vrot.slane %v3542_v60, 1  ;;  %v3548_v58 = vrot.slane %v3547_v17, 4  ;;  %v3692_v45 = vmul.f32 1.442695, %v3673_v59 }
 0x291   : > { %v3436_v29 = vmax.f32 %v2709_v31, %v3404_v18  ;;  %v3481_v15 = vmul.f32 %v6131_v42, %v3437_v23  ;;  %v5085_v31 = vpop.eup %5084 }
 0x292   : > { %v4914_v33 = vpop.f32.mrf.mxu1  ;;  %v3544_v9 = vadd.f32 %v3543_v24, %v3542_v60  ;;  %v3549_v25 = vadd.f32 %v3548_v58, %v3547_v17  ;;  %5088 = vpow2.f32 %v3692_v45  ;;  %v3719_v24 = vadd.f32 1.0, %v5085_v31 }
 0x293   : > { %v2789_v50 = vadd.f32 %v4914_v33, %v6125_v46  ;;  %v3480_v20 = vmul.f32 %v6133_v1, %v3436_v29  ;;  %v3555_v30 = vsel %vm581_vm1, %v3481_v15, 0.0  ;;  %5090 = vpow2.f32 %v3686_v0 }
 0x294   : > { %v2783_v40 = vpop.f32.mrf.mxu1  ;;  %v3550_v37 = vrot.slane %v3549_v25, 2  ;;  %v3658_v38 = vadd.f32 %v6160_v3, %v3544_v9 }
 0x295   : > { %v3407_v21 = vmul.f32 0.01, %v2789_v50  ;;  %v2784_v32 = vadd.f32 %v2783_v40, %v6123_v6  ;;  %v3554_v2 = vsel %vm581_vm1, %v3480_v20, 0.0 }
 0x296   : > { %v3551_v10 = vadd.f32 %v3550_v37, %v3549_v25  ;;  %v3556_v35 = vadd.f32 %v3555_v30, %v3554_v2  ;;  %v3674_v61 = vsub.f32 0.0, %v3658_v38 }
 0x297   : > { %v3439_v53 = vmax.f32 %v2789_v50, %v3407_v21  ;;  %v3406_v39 = vmul.f32 0.01, %v2784_v32  ;;  %v5087_v15 = vpop.eup %5086 }
 0x298   : > { %v3552_v43 = vrot.slane %v3551_v10, 1  ;;  %v3557_v41 = vrot.slane %v3556_v35, 4  ;;  %v3694_v34 = vmul.f32 1.442695, %v3674_v61  ;;  %v3720_v2 = vadd.f32 1.0, %v5087_v15 }
 0x299   : > { %v3438_v22 = vmax.f32 %v2784_v32, %v3406_v39  ;;  %v3483_v4 = vmul.f32 %v6131_v42, %v3439_v53 }
 0x29a   : > { %v4925_v12 = vpop.f32.mrf.mxu1  ;;  %v3553_v16 = vadd.f32 %v3552_v43, %v3551_v10  ;;  %v3558_v28 = vadd.f32 %v3557_v41, %v3556_v35  ;;  %5092 = vpow2.f32 %v3694_v34 }
 0x29b   : > { %v3482_v57 = vmul.f32 %v6133_v1, %v3438_v22  ;;  %v2864_v19 = vadd.f32 %v4925_v12, %v6125_v46  ;;  %v3564_v51 = vsel %vm581_vm1, %v3483_v4, 0.0 }
 0x29c   : > { %v2858_v48 = vpop.f32.mrf.mxu1  ;;  %v3559_v63 = vrot.slane %v3558_v28, 2  ;;  %v3659_v47 = vadd.f32 %v6160_v3, %v3553_v16 }
 0x29d   : > { %v3563_v62 = vsel %vm581_vm1, %v3482_v57, 0.0  ;;  %v3409_v54 = vmul.f32 0.01, %v2864_v19  ;;  %v2859_v36 = vadd.f32 %v2858_v48, %v6123_v6 }
 0x29e   : > { %v3565_v56 = vadd.f32 %v3564_v51, %v3563_v62  ;;  %v3560_v55 = vadd.f32 %v3559_v63, %v3558_v28  ;;  %v3675_v14 = vsub.f32 0.0, %v3659_v47 }
 0x29f   : > { %v3441_v44 = vmax.f32 %v2864_v19, %v3409_v54  ;;  %v3408_v52 = vmul.f32 0.01, %v2859_v36  ;;  %v5089_v7 = vpop.eup %5088 }
 0x2a0   : > { %v3566_v60 = vrot.slane %v3565_v56, 4  ;;  %v3561_v17 = vrot.slane %v3560_v55, 1  ;;  %v3696_v13 = vmul.f32 1.442695, %v3675_v14  ;;  %v5091_v38 = vpop.eup %5090  ;;  %v3721_v0 = vadd.f32 1.0, %v5089_v7 }
 0x2a1   : > { %v3440_v8 = vmax.f32 %v2859_v36, %v3408_v52  ;;  %v3485_v58 = vmul.f32 %v6131_v42, %v3441_v44  ;;  %v3718_v41 = vadd.f32 1.0, %v5091_v38  ;;  %v3774_v7 = vrot.slane %v5510_v26, 2 }
 0x2a2   : > { %v3567_v23 = vadd.f32 %v3566_v60, %v3565_v56  ;;  %v4936_v18 = vpop.f32.mrf.mxu1  ;;  %v3562_v11 = vadd.f32 %v3561_v17, %v3560_v55  ;;  %5094 = vpow2.f32 %v3696_v13 }
 0x2a3   : > { %v3484_v59 = vmul.f32 %v6133_v1, %v3440_v8  ;;  %v2939_v29 = vadd.f32 %v4936_v18, %v6125_v46  ;;  %5096 = vrcp.f32 %v3719_v24  ;;  %v3573_v45 = vsel %vm581_vm1, %v3485_v58, 0.0 }
 0x2a4   : > { %v3568_v33 = vrot.slane %v3567_v23, 2  ;;  %v2933_v9 = vpop.f32.mrf.mxu1  ;;  %v3660_v25 = vadd.f32 %v6160_v3, %v3562_v11  ;;  %v3773_v18 = vrot.slane %v5510_v26, 1 }
 0x2a5   : > { %v3572_v50 = vsel %vm581_vm1, %v3484_v59, 0.0  ;;  %v3411_v20 = vmul.f32 0.01, %v2939_v29  ;;  %v2934_v49 = vadd.f32 %v2933_v9, %v6123_v6 }
 0x2a6   : > { %v3569_v40 = vadd.f32 %v3568_v33, %v3567_v23  ;;  %v3676_v37 = vsub.f32 0.0, %v3660_v25  ;;  %v3574_v10 = vadd.f32 %v3573_v45, %v3572_v50 }
 0x2a7   : > { %v3443_v21 = vmax.f32 %v2939_v29, %v3411_v20  ;;  %v3410_v32 = vmul.f32 0.01, %v2934_v49  ;;  %v5093_v12 = vpop.eup %5092 }
 0x2a8   : > { %v3570_v30 = vrot.slane %v3569_v40, 1  ;;  %v3698_v35 = vmul.f32 1.442695, %v3676_v37  ;;  %v3575_v16 = vrot.slane %v3574_v10, 4  ;;  %v3722_v36 = vadd.f32 1.0, %v5093_v12 }
 0x2a9   : > { %v3487_v53 = vmul.f32 %v6131_v42, %v3443_v21  ;;  %v3442_v39 = vmax.f32 %v2934_v49, %v3410_v32 }
 0x2aa   : > { %v3571_v61 = vadd.f32 %v3570_v30, %v3569_v40  ;;  %v4947_v43 = vpop.f32.mrf.mxu1  ;;  %5098 = vpow2.f32 %v3698_v35  ;;  %v3576_v56 = vadd.f32 %v3575_v16, %v3574_v10  ;;  %v3775_v40 = vrot.slane %v5510_v26, 3 }
 0x2ab   : > { %v3486_v22 = vmul.f32 %v6133_v1, %v3442_v39  ;;  %v3014_v4 = vadd.f32 %v4947_v43, %v6125_v46  ;;  %5100 = vrcp.f32 %v3720_v2  ;;  %v3582_v19 = vsel %vm581_vm1, %v3487_v53, 0.0 }
 0x2ac   : > { %v3008_v28 = vpop.f32.mrf.mxu1  ;;  %v3661_v57 = vadd.f32 %v6160_v3, %v3571_v61  ;;  %5102 = vrcp.f32 %v3721_v0  ;;  %v3577_v11 = vrot.slane %v3576_v56, 2 }
 0x2ad   : > { %v3581_v34 = vsel %vm581_vm1, %v3486_v22, 0.0  ;;  %v3413_v48 = vmul.f32 0.01, %v3014_v4  ;;  %v3009_v63 = vadd.f32 %v3008_v28, %v6123_v6  ;;  %5104 = vrcp.f32 %v3718_v41 }
 0x2ae   : > { %v3583_v47 = vadd.f32 %v3582_v19, %v3581_v34  ;;  %v3677_v62 = vsub.f32 0.0, %v3661_v57  ;;  %v3578_v45 = vadd.f32 %v3577_v11, %v3576_v56 }
 0x2af   : > { %v3445_v51 = vmax.f32 %v3014_v4, %v3413_v48  ;;  %v3412_v54 = vmul.f32 0.01, %v3009_v63  ;;  %v5095_v31 = vpop.eup %5094 }
 0x2b0   : > { %v3584_v55 = vrot.slane %v3583_v47, 4  ;;  %v3700_v14 = vmul.f32 1.442695, %v3677_v62  ;;  %v5097_v13 = vpop.eup %5096  ;;  %v3723_v58 = vadd.f32 1.0, %v5095_v31  ;;  %v3579_v22 = vrot.slane %v3578_v45, 1 }
 0x2b1   : > { %v3489_v44 = vmul.f32 %v6131_v42, %v3445_v51  ;;  %v3444_v52 = vmax.f32 %v3009_v63, %v3412_v54  ;;  %v6212_v37 = vmul.f32 %v5097_v13, %v3773_v18  ;;  %v3776_v62 = vrot.slane %v5510_v26, 4 }
 0x2b2   : > { %v3585_v60 = vadd.f32 %v3584_v55, %v3583_v47  ;;  %v4958_v17 = vpop.f32.mrf.mxu1  ;;  %5106 = vpow2.f32 %v3700_v14  ;;  %v3777_v55 = vrot.slane %v5510_v26, 5  ;;  %v3580_v13 = vadd.f32 %v3579_v22, %v3578_v45 }
 0x2b3   : > { %v3488_v8 = vmul.f32 %v6133_v1, %v3444_v52  ;;  %v3089_v23 = vadd.f32 %v4958_v17, %v6125_v46  ;;  %5108 = vrcp.f32 %v3722_v36  ;;  %v3591_v59 = vsel %vm581_vm1, %v3489_v44, 0.0 }
 0x2b4   : > { %v3083_v24 = vpop.f32.mrf.mxu1  ;;  %v3586_v9 = vrot.slane %v3585_v60, 2  ;;  %5110 = vrcp.f32 %v3723_v58  ;;  %v3820_v28 = vand.u32 2147483647, %v6212_v37  ;;  %v3778_v58 = vrot.slane %v5510_v26, 6 }
 0x2b5   : > { %v3590_v29 = vsel %vm581_vm1, %v3488_v8, 0.0  ;;  %v3415_v15 = vmul.f32 0.01, %v3089_v23  ;;  %v3084_v33 = vadd.f32 %v3083_v24, %v6123_v6 }
 0x2b6   : > { %v3592_v25 = vadd.f32 %v3591_v59, %v3590_v29  ;;  %v3587_v35 = vadd.f32 %v3586_v9, %v3585_v60  ;;  %v3851_v17 = vrot.slane %v3820_v28, 7 }
 0x2b7   : > { %v5099_v50 = vpop.eup %5098  ;;  %v3447_v20 = vmax.f32 %v3089_v23, %v3415_v15  ;;  %v3414_v49 = vmul.f32 0.01, %v3084_v33 }
 0x2b8   : > { %v5101_v38 = vpop.eup %5100  ;;  %v3593_v21 = vrot.slane %v3592_v25, 4  ;;  %v3724_v32 = vadd.f32 1.0, %v5099_v50  ;;  %v3588_v63 = vrot.slane %v3587_v35, 1 }
 0x2b9   : > { %v5103_v2 = vpop.eup %5102  ;;  %v3491_v30 = vmul.f32 %v6131_v42, %v3447_v20  ;;  %v3446_v10 = vmax.f32 %v3084_v33, %v3414_v49  ;;  %v6217_v41 = vmul.f32 %v5101_v38, %v3774_v7 }
 0x2ba   : > { %v3594_v0 = vadd.f32 %v3593_v21, %v3592_v25  ;;  %v4969_v53 = vpop.f32.mrf.mxu1  ;;  %v5105_v39 = vpop.eup %5104  ;;  %5112 = vrcp.f32 %v3724_v32  ;;  %v6219_v16 = vmul.f32 %v5103_v2, %v3775_v40  ;;  %v3589_v11 = vadd.f32 %v3588_v63, %v3587_v35 }
 0x2bb   : > { %v3490_v61 = vmul.f32 %v6133_v1, %v3446_v10  ;;  %v3164_v43 = vadd.f32 %v4969_v53, %v6125_v46  ;;  %v3600_v57 = vsel %vm581_vm1, %v3491_v30, 0.0  ;;  %v6227_v51 = vmul.f32 %v5105_v39, %v5510_v26 }
 0x2bc   : > { %v3595_v4 = vrot.slane %v3594_v0, 2  ;;  %v3158_v12 = vpop.f32.mrf.mxu1  ;;  %v3821_v14 = vand.u32 2147483647, %v6217_v41  ;;  %v3822_v18 = vand.u32 2147483647, %v6219_v16  ;;  %v6241_v40 = vadd.f32 %v6160_v3, %v3580_v13 }
 0x2bd   : > { %v3599_v19 = vsel %vm581_vm1, %v3490_v61, 0.0  ;;  %v3417_v34 = vmul.f32 0.01, %v3164_v43  ;;  %v3159_v48 = vadd.f32 %v3158_v12, %v6123_v6  ;;  %v3819_v59 = vand.u32 2147483647, %v6227_v51 }
 0x2be   : > { %v3601_v47 = vadd.f32 %v3600_v57, %v3599_v19  ;;  %v3596_v44 = vadd.f32 %v3595_v4, %v3594_v0  ;;  %v3854_v9 = vrot.slane %v3821_v14, 6  ;;  %v3857_v32 = vrot.slane %v3822_v18, 5 }
 0x2bf   : > { %v5107_v54 = vpop.eup %5106  ;;  %v3449_v36 = vmax.f32 %v3164_v43, %v3417_v34  ;;  %v3416_v56 = vmul.f32 0.01, %v3159_v48  ;;  %v3853_v20 = vsel %vm3852_vm4, %v3851_v17, %v3819_v59  ;;  %v6246_v2 = vadd.f32 %v6160_v3, %v3589_v11 }
 0x2c0   : > { %v5109_v31 = vpop.eup %5108  ;;  %v3602_v52 = vrot.slane %v3601_v47, 4  ;;  %v3725_v60 = vadd.f32 1.0, %v5107_v54  ;;  %v3597_v25 = vrot.slane %v3596_v44, 1  ;;  %v3779_v53 = vrot.slane %v5510_v26, 7 }
 0x2c1   : > { %v3493_v8 = vmul.f32 %v6131_v42, %v3449_v36  ;;  %v3448_v23 = vmax.f32 %v3159_v48, %v3416_v56  ;;  %v6236_v33 = vmul.f32 %v5109_v31, %v3776_v62  ;;  %v5111_v49 = vpop.eup %5110  ;;  %v3856_v61 = vsel %vm3855_vm5, %v3854_v9, %v3853_v20 }
 0x2c2   : > { %v3603_v24 = vadd.f32 %v3602_v52, %v3601_v47  ;;  %v4980_v15 = vpop.f32.mrf.mxu1  ;;  %5114 = vrcp.f32 %v3725_v60  ;;  %v3598_v22 = vadd.f32 %v3597_v25, %v3596_v44  ;;  %v6252_v28 = vmul.f32 %v5111_v49, %v3777_v55 }
 0x2c3   : > { %v3492_v29 = vmul.f32 %v6133_v1, %v3448_v23  ;;  %v3239_v50 = vadd.f32 %v4980_v15, %v6125_v46  ;;  %v3609_v38 = vsel %vm581_vm1, %v3493_v8, 0.0  ;;  %v3823_v39 = vand.u32 2147483647, %v6236_v33 }
 0x2c4   : > { %v3604_v7 = vrot.slane %v3603_v24, 2  ;;  %v3233_v21 = vpop.f32.mrf.mxu1  ;;  %v3678_v57 = vsub.f32 0.0, %v6241_v40  ;;  %v3859_v48 = vsel %vm3858_vm6, %v3857_v32, %v3856_v61  ;;  %v3679_v63 = vsub.f32 0.0, %v6246_v2 }
 0x2c5   : > { %v3608_v45 = vsel %vm581_vm1, %v3492_v29, 0.0  ;;  %v3419_v35 = vmul.f32 0.01, %v3239_v50  ;;  %v3234_v0 = vadd.f32 %v3233_v21, %v6123_v6  ;;  %v3860_v44 = vrot.slane %v3823_v39, 4 }
 0x2c6   : > { %v3605_v30 = vadd.f32 %v3604_v7, %v3603_v24  ;;  %v3610_v10 = vadd.f32 %v3609_v38, %v3608_v45  ;;  %v3664_v52 = vadd.f32 %v6160_v3, %v3598_v22  ;;  %v3824_v8 = vand.u32 2147483647, %v6252_v28 }
 0x2c7   : > { %v5113_v43 = vpop.eup %5112  ;;  %v3451_v19 = vmax.f32 %v3239_v50, %v3419_v35  ;;  %v3418_v34 = vmul.f32 0.01, %v3234_v0  ;;  %v3862_v45 = vsel %vm3861_vm7, %v3860_v44, %v3859_v48 }
 0x2c8   : > { %v3606_v4 = vrot.slane %v3605_v30, 1  ;;  %v3611_v12 = vrot.slane %v3610_v10, 4  ;;  %v6257_v36 = vmul.f32 %v5113_v43, %v3778_v58  ;;  %v3863_v21 = vrot.slane %v3824_v8, 3 }
 0x2c9   : > { %v3495_v56 = vmul.f32 %v6131_v42, %v3451_v19  ;;  %v3450_v14 = vmax.f32 %v3234_v0, %v3418_v34 }
 0x2ca   : > { %v3607_v47 = vadd.f32 %v3606_v4, %v3605_v30  ;;  %v3612_v62 = vadd.f32 %v3611_v12, %v3610_v10  ;;  %v4991_v54 = vpop.f32.mrf.mxu0  ;;  %v5002_v31 = vpop.f32.mrf.mxu1  ;;  %v3825_v9 = vand.u32 2147483647, %v6257_v36  ;;  %v3680_v10 = vsub.f32 0.0, %v3664_v52 }
 0x2cb   : > { %v3314_v55 = vadd.f32 %v4991_v54, %v6125_v46  ;;  %v3389_v17 = vadd.f32 %v5002_v31, %v6125_v46  ;;  %v3494_v18 = vmul.f32 %v6133_v1, %v3450_v14  ;;  %v3618_v46 = vsel %vm581_vm1, %v3495_v56, 0.0 }
 0x2cc   : > { %v3613_v60 = vrot.slane %v3612_v62, 2  ;;  %v3308_v13 = vpop.f32.mrf.mxu0  ;;  %v3665_v23 = vadd.f32 %v6160_v3, %v3607_v47  ;;  %v3383_v58 = vpop.f32.mrf.mxu1  ;;  %v3866_v4 = vrot.slane %v3825_v9, 2  ;;  %v3704_v47 = vmul.f32 1.442695, %v3679_v63 }
 0x2cd   : > { %v3421_v11 = vmul.f32 0.01, %v3314_v55  ;;  %v3309_v24 = vadd.f32 %v3308_v13, %v6123_v6  ;;  %v3423_v29 = vmul.f32 0.01, %v3389_v17  ;;  %v3384_v15 = vadd.f32 %v3383_v58, %v6123_v6 }
 0x2ce   : > { %v3614_v59 = vadd.f32 %v3613_v60, %v3612_v62  ;;  %v3617_v25 = vsel %vm581_vm1, %v3494_v18, 0.0  ;;  %v3681_v61 = vsub.f32 0.0, %v3665_v23  ;;  %v3706_v31 = vmul.f32 1.442695, %v3680_v10 }
 0x2cf   : > { %v3453_v7 = vmax.f32 %v3314_v55, %v3421_v11  ;;  %v3420_v50 = vmul.f32 0.01, %v3309_v24  ;;  %v5115_v20 = vpop.eup %5114  ;;  %v3619_v38 = vadd.f32 %v3618_v46, %v3617_v25  ;;  %v3455_v2 = vmax.f32 %v3389_v17, %v3423_v29 }
 0x2d0   : > { %v3615_v49 = vrot.slane %v3614_v59, 1  ;;  %v3422_v6 = vmul.f32 0.01, %v3384_v15  ;;  %v6273_v39 = vmul.f32 %v5115_v20, %v3779_v53  ;;  %v3865_v53 = vsel %vm3864_vm8, %v3863_v21, %v3862_v45 }
 0x2d1   : > { %v3497_v32 = vmul.f32 %v6131_v42, %v3453_v7  ;;  %v3452_v30 = vmax.f32 %v3309_v24, %v3420_v50  ;;  %v3620_v0 = vrot.slane %v3619_v38, 4  ;;  %v3499_v43 = vmul.f32 %v6131_v42, %v3455_v2 }
 0x2d2   : > { %v3616_v35 = vadd.f32 %v3615_v49, %v3614_v59  ;;  %v3454_v34 = vmax.f32 %v3384_v15, %v3422_v6  ;;  %v3826_v48 = vand.u32 2147483647, %v6273_v39  ;;  %v3708_v44 = vmul.f32 1.442695, %v3681_v61 }
 0x2d3   : > { %v3496_v22 = vmul.f32 %v6133_v1, %v3452_v30  ;;  %v3621_v19 = vadd.f32 %v3620_v0, %v3619_v38  ;;  %v3627_v62 = vsel %vm581_vm1, %v3497_v32, 0.0  ;;  %v3636_v52 = vsel %vm581_vm1, %v3499_v43, 0.0 }
 0x2d4   : > { %v3666_v12 = vadd.f32 %v6160_v3, %v3616_v35  ;;  %v3498_v42 = vmul.f32 %v6133_v1, %v3454_v34  ;;  %v3869_v60 = vrot.slane %v3826_v48, 1  ;;  %v3868_v8 = vsel %vm3867_vm9, %v3866_v4, %v3865_v53 }
 0x2d5   : > { %v3626_v54 = vsel %vm581_vm1, %v3496_v22, 0.0  ;;  %v3622_v14 = vrot.slane %v3621_v19, 2  ;;  %5116 = vpow2.f32 %v3704_v47  ;;  %v3702_v59 = vmul.f32 1.442695, %v3678_v57 }
 0x2d6   : > { %v3682_v56 = vsub.f32 0.0, %v3666_v12  ;;  %v3628_v55 = vadd.f32 %v3627_v62, %v3626_v54  ;;  %v3635_v63 = vsel %vm581_vm1, %v3498_v42, 0.0  ;;  %v3871_v11 = vsel %vm3870_vm10, %v3869_v60, %v3868_v8 }
 0x2d7   : > { %v3623_v17 = vadd.f32 %v3622_v14, %v3621_v19  ;;  %v3637_v18 = vadd.f32 %v3636_v52, %v3635_v63  ;;  %v3888_v1 = vsel %vm581_vm1, %v3871_v11, 0.0  ;;  %5118 = vpow2.f32 %v3706_v31 }
 0x2d8   : > { %v3629_v13 = vrot.slane %v3628_v55, 4  ;;  %v3710_v23 = vmul.f32 1.442695, %v3682_v56  ;;  %3889 = vadd.xlane.f32.xlu1 %v3888_v1  ;;  %5120 = vpow2.f32 %v3708_v44  ;;  %v3765_v46 = vsel %vm581_vm1, %v5510_v26, 0.0 }
 0x2d9   : > { %v3624_v24 = vrot.slane %v3623_v17, 1  ;;  %v3638_v29 = vrot.slane %v3637_v18, 4  ;;  %v3780_v14 = vrot.slane %v5515_v27, 1  ;;  %v3781_v31 = vrot.slane %v5515_v27, 2 }
 0x2da   : > { %v3630_v58 = vadd.f32 %v3629_v13, %v3628_v55  ;;  %5122 = vpow2.f32 %v3710_v23  ;;  %v3782_v52 = vrot.slane %v5515_v27, 3  ;;  %v3784_v63 = vrot.slane %v5515_v27, 5 }
 0x2db   : > { %v3625_v15 = vadd.f32 %v3624_v24, %v3623_v17  ;;  %v3639_v25 = vadd.f32 %v3638_v29, %v3637_v18  ;;  %5124 = vpow2.f32 %v3702_v59  ;;  %v3783_v17 = vrot.slane %v5515_v27, 4 }
 0x2dc   : > { %v3631_v9 = vrot.slane %v3630_v58, 2  ;;  %3766 = vadd.xlane.f32.xlu1 %v3765_v46  ;;  %v3785_v46 = vrot.slane %v5515_v27, 6 }
 0x2dd   : > { %v3667_v7 = vadd.f32 %v6160_v3, %v3625_v15  ;;  %v3640_v20 = vrot.slane %v3639_v25, 2 }
 0x2de   : > { %v3632_v50 = vadd.f32 %v3631_v9, %v3630_v58 }
 0x2df   : > { %v3683_v49 = vsub.f32 0.0, %v3667_v7  ;;  %v3641_v57 = vadd.f32 %v3640_v20, %v3639_v25  ;;  %v3786_v20 = vrot.slane %v5515_v27, 7 }
 0x2e0   : > { %v3633_v40 = vrot.slane %v3632_v50, 1 }
 0x2e1   : > { %v3712_v38 = vmul.f32 1.442695, %v3683_v49  ;;  %v3642_v21 = vrot.slane %v3641_v57, 1 }
 0x2e2   : > { %v3634_v45 = vadd.f32 %v3633_v40, %v3632_v50  ;;  %v5117_v26 = vpop.eup %5116 }
 0x2e3   : > { %5126 = vpow2.f32 %v3712_v38  ;;  %v3643_v2 = vadd.f32 %v3642_v21, %v3641_v57  ;;  %v3727_v22 = vadd.f32 1.0, %v5117_v26 }
 0x2e4   : > { %v3668_v32 = vadd.f32 %v6160_v3, %v3634_v45  ;;  %v5119_v10 = vpop.eup %5118 }
 0x2e5   : > { %v3669_v6 = vadd.f32 %v6160_v3, %v3643_v2  ;;  %v5121_v0 = vpop.eup %5120  ;;  %v3728_v4 = vadd.f32 1.0, %v5119_v10 }
 0x2e6   : > { %v3684_v30 = vsub.f32 0.0, %v3668_v32  ;;  %v3729_v34 = vadd.f32 1.0, %v5121_v0 }
 0x2e7   : > { %v3685_v61 = vsub.f32 0.0, %v3669_v6  ;;  %v5123_v43 = vpop.eup %5122 }
 0x2e8   : > { %v3714_v35 = vmul.f32 1.442695, %v3684_v30  ;;  %v5125_v19 = vpop.eup %5124  ;;  %v3730_v48 = vadd.f32 1.0, %v5123_v43 }
 0x2e9   : > { %v3716_v12 = vmul.f32 1.442695, %v3685_v61  ;;  %v3726_v47 = vadd.f32 1.0, %v5125_v19 }
 0x2ea   : > { %5128 = vpow2.f32 %v3714_v35 }
 0x2eb   : > { %5130 = vpow2.f32 %v3716_v12 }
 0x2ec   : > { %5132 = vrcp.f32 %v3727_v22 }
 0x2ed   : > { %5134 = vrcp.f32 %v3728_v4 }
 0x2ee   : > { %5136 = vrcp.f32 %v3729_v34 }
 0x2ef   : > { %5138 = vrcp.f32 %v3730_v48  ;;  %v3768_v48 = vsel %vm581_vm1, %v5515_v27, 0.0 }
 0x2f0   : > { %v5127_v62 = vpop.eup %5126  ;;  %5140 = vrcp.f32 %v3726_v47 }
 0x2f1   : > { %v3731_v3 = vadd.f32 1.0, %v5127_v62 }
 0x2f3   : > { %5142 = vrcp.f32 %v3731_v3  ;;  %v5300_v3 = vmov 0.0  }
 0x2f7   : > { %v5129_v54 = vpop.eup %5128 }
 0x2f8   : > { %v3732_v53 = vadd.f32 1.0, %v5129_v54  ;;  %v5131_v56 = vpop.eup %5130 }
 0x2f9   : > { %v5133_v55 = vpop.eup %5132  ;;  %v3733_v42 = vadd.f32 1.0, %v5131_v56 }
 0x2fa   : > { %5144 = vrcp.f32 %v3732_v53  ;;  %v5135_v44 = vpop.eup %5134  ;;  %v6300_v8 = vmul.f32 %v5133_v55, %v3780_v14  ;;  %v4488_v53 = vsel %vm3761_vm2, 1.0, %v5300_v3 }
 0x2fb   : > { %v5137_v60 = vpop.eup %5136  ;;  %5146 = vrcp.f32 %v3733_v42  ;;  %v6302_v23 = vmul.f32 %v5135_v44, %v3781_v31  ;;  %v3954_v42 = vrot.slane %v4488_v53, 1  ;;  %v3955_v31 = vrot.slane %v4488_v53, 2 }
 0x2fc   : > { %v5139_v13 = vpop.eup %5138  ;;  %v6304_v11 = vmul.f32 %v5137_v60, %v3782_v52  ;;  %v3828_v59 = vand.u32 2147483647, %v6300_v8  ;;  %v3956_v44 = vrot.slane %v4488_v53, 3  ;;  %v3957_v52 = vrot.slane %v4488_v53, 4 }
 0x2fd   : > { %v5141_v18 = vpop.eup %5140  ;;  %v6306_v58 = vmul.f32 %v5139_v13, %v3783_v17  ;;  %v3829_v29 = vand.u32 2147483647, %v6302_v23  ;;  %v3958_v60 = vrot.slane %v4488_v53, 5  ;;  %v3959_v17 = vrot.slane %v4488_v53, 6 }
 0x2fe   : > { %v6313_v15 = vmul.f32 %v5141_v18, %v5515_v27  ;;  %v3830_v9 = vand.u32 2147483647, %v6304_v11  ;;  %v3872_v50 = vrot.slane %v3828_v59, 7  ;;  %v3960_v27 = vrot.slane %v4488_v53, 7 }
 0x2ff   : > { %v3831_v25 = vand.u32 2147483647, %v6306_v58  ;;  %v3874_v49 = vrot.slane %v3829_v29, 6 }
 0x300   : > { %v5143_v24 = vpop.eup %5142  ;;  %v3827_v57 = vand.u32 2147483647, %v6313_v15  ;;  %v3876_v38 = vrot.slane %v3830_v9, 5 }
 0x301   : > { %v6308_v1 = vmul.f32 %v5143_v24, %v3784_v63  ;;  %v3878_v21 = vrot.slane %v3831_v25, 4 }
 0x302   : > { %v3873_v2 = vsel %vm3852_vm4, %v3872_v50, %v3827_v57 }
 0x303   : > { %v3832_v7 = vand.u32 2147483647, %v6308_v1  ;;  %v3875_v10 = vsel %vm3855_vm5, %v3874_v49, %v3873_v2 }
 0x304   : > { %v3877_v35 = vsel %vm3858_vm6, %v3876_v38, %v3875_v10 }
 0x305   : > { %v3880_v30 = vrot.slane %v3832_v7, 3  ;;  %v3879_v61 = vsel %vm3861_vm7, %v3878_v21, %v3877_v35 }
 0x307   : > { %v5145_v40 = vpop.eup %5144  ;;  %v3881_v22 = vsel %vm3864_vm8, %v3880_v30, %v3879_v61 }
 0x308   : > { %v6321_v45 = vmul.f32 %v5145_v40, %v3785_v46  ;;  %v5147_v32 = vpop.eup %5146 }
 0x309   : > { %v6324_v26 = vmul.f32 %v5147_v32, %v3786_v20 }
 0x30a   : > { %v3833_v6 = vand.u32 2147483647, %v6321_v45 }
 0x30b   : > { %v3834_v0 = vand.u32 2147483647, %v6324_v26 }
 0x30c   : > { %v3882_v43 = vrot.slane %v3833_v6, 2 }
 0x30d   : > { %v3884_v12 = vrot.slane %v3834_v0, 1 }
 0x30e   : > { %v3883_v4 = vsel %vm3867_vm9, %v3882_v43, %v3881_v22 }
 0x30f   : > { %v3885_v19 = vsel %vm3870_vm10, %v3884_v12, %v3883_v4 }
 0x310   : > { %v3891_v34 = vsel %vm581_vm1, %v3885_v19, 0.0 }
 0x311   : > { %3892 = vadd.xlane.f32.xlu0 %v3891_v34 }
 0x315   : > { %3769 = vadd.xlane.f32.xlu0 %v3768_v48 }
 0x361   : > { %v3890_v47 = vpop.xlane.xlu1 %3889 }
 0x362   : > { %v3894_v62 = vmax.f32 %v3890_v47, 1e-12 }
 0x364   : > { %5148 = vrcp.f32 %v3894_v62 }
 0x365   : > { %v3767_v56 = vpop.xlane.xlu1 %3766 }
 0x371   : > { %v5149_v14 = vpop.eup %5148 }
 0x372   : > { %v3898_v55 = vmul.f32 %v5149_v14, %v3767_v56  ;;  %v6620_v14 = vld [vmem:[#allocation15_spill] sm:$0xff] }
 0x374   : > { %v3902_v13 = vrot.slane %v3898_v55, 1  ;;  %v3903_v63 = vrot.slane %v3898_v55, 2  ;;  %v3904_v18 = vrot.slane %v3898_v55, 3  ;;  %v3905_v24 = vrot.slane %v3898_v55, 4 }
 0x375   : > { %v3906_v59 = vrot.slane %v3898_v55, 5  ;;  %v3907_v29 = vrot.slane %v3898_v55, 6  ;;  %v3908_v9 = vrot.slane %v3898_v55, 7  ;;  %v3932_v5 = vmul.f32 %v3898_v55, %v6227_v51 }
 0x376   : > { %v3933_v46 = vmul.f32 %v3902_v13, %v6212_v37  ;;  %v3934_v25 = vmul.f32 %v3903_v63, %v6217_v41  ;;  %v3935_v7 = vmul.f32 %v3904_v18, %v6219_v16  ;;  %v3936_v50 = vmul.f32 %v3905_v24, %v6236_v33 }
 0x377   : > { %v3937_v20 = vmul.f32 %v3906_v59, %v6252_v28  ;;  %v3938_v49 = vmul.f32 %v3907_v29, %v6257_v36  ;;  %v3939_v40 = vmul.f32 %v3908_v9, %v6273_v39  ;;  %v3984_v57 = vadd.f32 %v4488_v53, %v3932_v5 }
 0x378   : > { %v3985_v38 = vadd.f32 %v3954_v42, %v3933_v46  ;;  %v3986_v21 = vadd.f32 %v3955_v31, %v3934_v25  ;;  %v3987_v32 = vadd.f32 %v3956_v44, %v3935_v7  ;;  %v3988_v2 = vadd.f32 %v3957_v52, %v3936_v50  ;;  %v6621_v31 = vld [vmem:[#allocation14_spill] sm:$0xff]  ;;  %v6622_v52 = vld [vmem:[#allocation17_spill] sm:$0xff] }
 0x379   : > { %v3989_v51 = vadd.f32 %v3958_v60, %v3937_v20  ;;  %v3990_v30 = vadd.f32 %v3959_v17, %v3938_v49  ;;  %v3991_v37 = vadd.f32 %v3960_v27, %v3939_v40  ;;  %v6357_v28 = vadd.f32 1e-06, %v3984_v57  ;;  %v6623_v17 = vld [vmem:[#allocation16_spill] sm:$0xff] }
 0x37a   : > { %v6349_v6 = vadd.f32 1e-06, %v3985_v38  ;;  %v6351_v41 = vadd.f32 1e-06, %v3986_v21  ;;  %v6353_v16 = vadd.f32 1e-06, %v3987_v32 }
 0x37b   : > { %v6355_v33 = vadd.f32 1e-06, %v3988_v2  ;;  %v6359_v36 = vadd.f32 1e-06, %v3989_v51  ;;  %v6363_v35 = vadd.f32 1e-06, %v3990_v30 }
 0x37c   : > { %v4032_v39 = vrot.slane %v6349_v6, 7  ;;  %v4034_v10 = vrot.slane %v6351_v41, 6  ;;  %v6365_v0 = vadd.f32 1e-06, %v3991_v37  ;;  %v4036_v43 = vrot.slane %v6353_v16, 5 }
 0x37d   : > { %v4038_v4 = vrot.slane %v6355_v33, 4  ;;  %v4040_v19 = vrot.slane %v6359_v36, 3  ;;  %v4042_v48 = vrot.slane %v6363_v35, 2  ;;  %v585_v55 = vsel %vm581_vm1, %v6620_v14, 0.0 }
 0x37e   : > { %v4033_v61 = vsel %vm3852_vm4, %v4032_v39, %v6357_v28  ;;  %v4044_v62 = vrot.slane %v6365_v0, 1  ;;  %v587_v44 = vsel %vm581_vm1, %v6621_v31, 0.0  ;;  %v571_v60 = vsel %vm487_vm0, %v6622_v52, 0.0 }
 0x37f   : > { %v4035_v22 = vsel %vm3855_vm5, %v4034_v10, %v4033_v61  ;;  %v586_v27 = vadd.f32 %v585_v55, %v6623_v17  ;;  %v4489_v59 = vsel %vm3762_vm3, 1.0, %v5300_v3 }
 0x380   : > { %v4037_v12 = vsel %vm3858_vm6, %v4036_v43, %v4035_v22  ;;  %v3961_v46 = vrot.slane %v4489_v59, 1  ;;  %v3962_v25 = vrot.slane %v4489_v59, 2  ;;  %v3963_v7 = vrot.slane %v4489_v59, 3 }
 0x381   : > { %v4039_v34 = vsel %vm3861_vm7, %v4038_v4, %v4037_v12  ;;  %v6388_v13 = vadd.f32 %v587_v44, %v586_v27  ;;  %v3964_v50 = vrot.slane %v4489_v59, 4  ;;  %v3965_v20 = vrot.slane %v4489_v59, 5 }
 0x382   : > { %v4041_v47 = vsel %vm3864_vm8, %v4040_v19, %v4039_v34  ;;  %v3966_v49 = vrot.slane %v4489_v59, 6  ;;  %v3967_v40 = vrot.slane %v4489_v59, 7 }
 0x383   : > { %v4043_v53 = vsel %vm3867_vm9, %v4042_v48, %v4041_v47 }
 0x384   : > { %v4045_v56 = vsel %vm3870_vm10, %v4044_v62, %v4043_v53 }
 0x385   : > { %v4062_v42 = vsel %vm581_vm1, %v4045_v56, 0.0 }
 0x386   : > { %4063 = vadd.xlane.f32.xlu1 %v4062_v42 }
 0x38a   : > { %572 = vadd.xlane.f32.xlu1 %v571_v60 }
 0x39a   : > { %v3893_v63 = vpop.xlane.xlu0 %3892 }
 0x39b   : > { %v3895_v18 = vmax.f32 %v3893_v63, 1e-12 }
 0x39d   : > { %5150 = vrcp.f32 %v3895_v18 }
 0x39e   : > { %v3770_v29 = vpop.xlane.xlu0 %3769 }
 0x3aa   : > { %v5151_v9 = vpop.eup %5150 }
 0x3ab   : > { %v3899_v5 = vmul.f32 %v5151_v9, %v3770_v29  ;;  %v6625_v9 = vld [vmem:[#allocation18_spill] sm:$0xff] }
 0x3ad   : > { %v3909_v57 = vrot.slane %v3899_v5, 1  ;;  %v3910_v38 = vrot.slane %v3899_v5, 2  ;;  %v3911_v21 = vrot.slane %v3899_v5, 3  ;;  %v3912_v32 = vrot.slane %v3899_v5, 4 }
 0x3ae   : > { %v3913_v2 = vrot.slane %v3899_v5, 5  ;;  %v3914_v51 = vrot.slane %v3899_v5, 6  ;;  %v3915_v30 = vrot.slane %v3899_v5, 7  ;;  %v3940_v54 = vmul.f32 %v3899_v5, %v6313_v15 }
 0x3af   : > { %v3941_v3 = vmul.f32 %v3909_v57, %v6300_v8  ;;  %v3942_v37 = vmul.f32 %v3910_v38, %v6302_v23  ;;  %v3943_v39 = vmul.f32 %v3911_v21, %v6304_v11  ;;  %v3944_v10 = vmul.f32 %v3912_v32, %v6306_v58  ;;  %v6626_v38 = vld [vmem:[#allocation20_spill] sm:$0xff] }
 0x3b0   : > { %v3945_v61 = vmul.f32 %v3913_v2, %v6308_v1  ;;  %v3946_v43 = vmul.f32 %v3914_v51, %v6321_v45  ;;  %v3947_v22 = vmul.f32 %v3915_v30, %v6324_v26  ;;  %v3992_v4 = vadd.f32 %v4489_v59, %v3940_v54 }
 0x3b1   : > { %v3993_v12 = vadd.f32 %v3961_v46, %v3941_v3  ;;  %v3994_v19 = vadd.f32 %v3962_v25, %v3942_v37  ;;  %v3995_v34 = vadd.f32 %v3963_v7, %v3943_v39  ;;  %v3996_v48 = vadd.f32 %v3964_v50, %v3944_v10 }
 0x3b2   : > { %v3997_v15 = vadd.f32 %v3965_v20, %v3945_v61  ;;  %v3998_v47 = vadd.f32 %v3966_v49, %v3946_v43  ;;  %v3999_v8 = vadd.f32 %v3967_v40, %v3947_v22  ;;  %v6410_v1 = vadd.f32 1e-06, %v3992_v4 }
 0x3b3   : > { %v6402_v62 = vadd.f32 1e-06, %v3993_v12  ;;  %v6404_v23 = vadd.f32 1e-06, %v3994_v19  ;;  %v6406_v11 = vadd.f32 1e-06, %v3995_v34 }
 0x3b4   : > { %v6408_v58 = vadd.f32 1e-06, %v3996_v48  ;;  %v6412_v45 = vadd.f32 1e-06, %v3997_v15  ;;  %v6416_v56 = vadd.f32 1e-06, %v3998_v47 }
 0x3b5   : > { %v4046_v26 = vrot.slane %v6402_v62, 7  ;;  %v4048_v53 = vrot.slane %v6404_v23, 6  ;;  %v6418_v14 = vadd.f32 1e-06, %v3999_v8  ;;  %v4050_v42 = vrot.slane %v6406_v11, 5 }
 0x3b6   : > { %v4052_v44 = vrot.slane %v6408_v58, 4  ;;  %v4054_v60 = vrot.slane %v6412_v45, 3  ;;  %v4056_v27 = vrot.slane %v6416_v56, 2  ;;  %v574_v5 = vsel %vm487_vm0, %v6625_v9, 0.0 }
 0x3b7   : > { %v4047_v55 = vsel %vm3852_vm4, %v4046_v26, %v6410_v1  ;;  %v4058_v18 = vrot.slane %v6418_v14, 1  ;;  %v589_v46 = vrot.slane %v6388_v13, 4  ;;  %v597_v21 = vmul.f32 2.0, %v6626_v38 }
 0x3b8   : > { %v4049_v31 = vsel %vm3855_vm5, %v4048_v53, %v4047_v55 }
 0x3b9   : > { %v4051_v52 = vsel %vm3858_vm6, %v4050_v42, %v4049_v31  ;;  %v590_v25 = vadd.f32 %v589_v46, %v6388_v13 }
 0x3ba   : > { %v4053_v17 = vsel %vm3861_vm7, %v4052_v44, %v4051_v52  ;;  %v6627_v52 = vld [vmem:[#allocation19_spill] sm:$0xff] }
 0x3bb   : > { %v4055_v63 = vsel %vm3864_vm8, %v4054_v60, %v4053_v17  ;;  %v591_v7 = vrot.slane %v590_v25, 2  ;;  %v598_v60 = vmul.f32 2.0, %v6627_v52 }
 0x3bc   : > { %v4057_v24 = vsel %vm3867_vm9, %v4056_v27, %v4055_v63 }
 0x3bd   : > { %v4059_v59 = vsel %vm3870_vm10, %v4058_v18, %v4057_v24  ;;  %v592_v50 = vadd.f32 %v591_v7, %v590_v25 }
 0x3be   : > { %v4065_v29 = vsel %vm581_vm1, %v4059_v59, 0.0 }
 0x3bf   : > { %4066 = vadd.xlane.f32.xlu0 %v4065_v29  ;;  %v593_v20 = vrot.slane %v592_v50, 1 }
 0x3c1   : > { %v594_v40 = vadd.f32 %v593_v20, %v592_v50 }
 0x3c3   : > { %575 = vadd.xlane.f32.xlu0 %v574_v5 }
 0x40f   : > { %v4064_v49 = vpop.xlane.xlu1 %4063 }
 0x410   : > { %5152 = vrcp.f32 %v4064_v49 }
 0x413   : > { %v573_v57 = vpop.xlane.xlu1 %572 }
 0x414   : > { %v595_v32 = vadd.f32 %v594_v40, %v573_v57 }
 0x416   : > { %v599_v2 = vsub.f32 %v595_v32, %v597_v21 }
 0x418   : > { %v601_v51 = vsub.f32 0.0, %v599_v2 }
 0x41a   : > { %603 = vst.msk [vmem:[%s6445_s29] sm:$0xff] %vm581_vm1, %v601_v51 }
 0x41d   : > { %v5153_v13 = vpop.eup %5152 }
 0x41e   : > { %v4072_v30 = vrot.slane %v5153_v13, 1  ;;  %v4073_v54 = vrot.slane %v5153_v13, 2  ;;  %v4074_v3 = vrot.slane %v5153_v13, 3  ;;  %v4075_v37 = vrot.slane %v5153_v13, 4 }
 0x41f   : > { %v4076_v39 = vrot.slane %v5153_v13, 5  ;;  %v4077_v10 = vrot.slane %v5153_v13, 6  ;;  %v4078_v61 = vrot.slane %v5153_v13, 7  ;;  %v4102_v19 = vmul.f32 %v5153_v13, %v6357_v28 }
 0x420   : > { %v4103_v43 = vmul.f32 %v4072_v30, %v6349_v6  ;;  %v4104_v22 = vmul.f32 %v4073_v54, %v6351_v41  ;;  %v4105_v4 = vmul.f32 %v4074_v3, %v6353_v16  ;;  %v4106_v12 = vmul.f32 %v4075_v37, %v6355_v33 }
 0x421   : > { %v4107_v34 = vmul.f32 %v4076_v39, %v6359_v36  ;;  %v4108_v47 = vmul.f32 %v4077_v10, %v6363_v35  ;;  %v4109_v8 = vmul.f32 %v4078_v61, %v6365_v0 }
 0x422   : > { %v4134_v48 = vrot.slane %v4103_v43, 7  ;;  %v4136_v15 = vrot.slane %v4104_v22, 6  ;;  %v4138_v6 = vrot.slane %v4105_v4, 5  ;;  %v4140_v53 = vrot.slane %v4106_v12, 4 }
 0x423   : > { %v4142_v33 = vrot.slane %v4107_v34, 3  ;;  %v4144_v36 = vrot.slane %v4108_v47, 2  ;;  %v4146_v35 = vrot.slane %v4109_v8, 1 }
 0x424   : > { %v4135_v26 = vsel %vm3852_vm4, %v4134_v48, %v4102_v19 }
 0x425   : > { %v4137_v41 = vsel %vm3855_vm5, %v4136_v15, %v4135_v26 }
 0x426   : > { %v4139_v16 = vsel %vm3858_vm6, %v4138_v6, %v4137_v41 }
 0x427   : > { %v4141_v28 = vsel %vm3861_vm7, %v4140_v53, %v4139_v16 }
 0x428   : > { %v4143_v55 = vsel %vm3864_vm8, %v4142_v33, %v4141_v28 }
 0x429   : > { %v4145_v0 = vsel %vm3867_vm9, %v4144_v36, %v4143_v55 }
 0x42a   : > { %v4147_v42 = vsel %vm3870_vm10, %v4146_v35, %v4145_v0 }
 0x42b   : > { %4164 = vst.msk [vmem:[%s6466_s13] sm:$0xff] %vm581_vm1, %v4147_v42 }
 0x448   : > { %v4067_v31 = vpop.xlane.xlu0 %4066 }
 0x449   : > { %5154 = vrcp.f32 %v4067_v31 }
 0x44c   : > { %v576_v44 = vpop.xlane.xlu0 %575 }
 0x44d   : > { %v596_v17 = vadd.f32 %v594_v40, %v576_v44 }
 0x44f   : > { %v600_v27 = vsub.f32 %v596_v17, %v598_v60 }
 0x451   : > { %v602_v63 = vsub.f32 0.0, %v600_v27 }
 0x453   : > { %604 = vst.msk [vmem:[%s6445_s29 + $0x8] sm:$0xff] %vm581_vm1, %v602_v63 }
 0x454   : > { %5196 = shalt.err (!%p5193_p3)
}
 0x455   : > { %s5197_s29 = scalar_lea.hbm %s6478_s25, 256  ;;  %s5201_s12 = scalar_lea.hbm %s6593_s10, 512 }
 0x456   : > { %p5198_p5 = scmp.ne.s32.totalorder %s6478_s25, %s5197_s29  ;;  %p5202_p9 = scmp.lt.s32.totalorder %s6478_s25, %s6593_s10 }
 0x457   : > { %p5203_p12 = scmp.lt.s32.totalorder %s5201_s12, %s5197_s29 }
 0x458   : > { %p5199_p6 = pnand %p5198_p5, %p5403_p4 }
 0x459   : > { %p5204_p10 = por %p5203_p12, %p5202_p9 }
 0x45a   : > { %p5200_p7 = pneg %p5199_p6 }
 0x45c   : > { %p5205_p11 = pnand %p5204_p10, %p5200_p7 }
 0x45e   : > { %5208 = shalt.err (!%p5205_p11)
}
 0x45f   : > { %s5302_s0 = smov 128   ;;  %s5303_s1 = smov 8   ;;  %v5155_v18 = vpop.eup %5154 }
 0x460   : > { %s6628_s28 = scalar_lea.sflag [#allocation8], %s6439_s11  ;;  %v4079_v24 = vrot.slane %v5155_v18, 1  ;;  %v4080_v59 = vrot.slane %v5155_v18, 2  ;;  %v4081_v29 = vrot.slane %v5155_v18, 3  ;;  %v4082_v9 = vrot.slane %v5155_v18, 4  ;;  %s4187_s14 = sshll.u32 %s6466_s13, 4  ;;  %s6532_s14 = int_to_ptr.vmem [resolvable:$true] %s4187_s14 }
 0x461   : > { %5008 = dma.vmem_to_hbm [thread:$0]  (%p5403_p4), %s6480_s8, 256, %s6478_s25, %s6628_s28, %s5302_s0, %s5302_s0, %s5303_s1   ;;  %v4083_v5 = vrot.slane %v5155_v18, 5  ;;  %v4084_v46 = vrot.slane %v5155_v18, 6  ;;  %v4085_v25 = vrot.slane %v5155_v18, 7  ;;  %v4110_v40 = vmul.f32 %v5155_v18, %v6410_v1 }
 0x462   : > { %v4111_v7 = vmul.f32 %v4079_v24, %v6402_v62  ;;  %v4112_v50 = vmul.f32 %v4080_v59, %v6404_v23  ;;  %v4113_v20 = vmul.f32 %v4081_v29, %v6406_v11  ;;  %v4114_v49 = vmul.f32 %v4082_v9, %v6408_v58  ;;  %s6629_s8 = sshll.u32 %s5285_s18, 8  ;;  %s4167_s21 = scalar_lea.sflag [#allocation5], %s6439_s11 }
 0x463   : > { %v4115_v57 = vmul.f32 %v4083_v5, %v6412_v45  ;;  %v4116_v32 = vmul.f32 %v4084_v46, %v6416_v56  ;;  %v4117_v2 = vmul.f32 %v4085_v25, %v6418_v14  ;;  %s6530_s29 = scalar_lea.hbm %s6592_s9, %s6629_s8  ;;  %s5209_s23 = scalar_lea.vmem %s6532_s14, 256 }
 0x464   : > { %v4148_v38 = vrot.slane %v4111_v7, 7  ;;  %v4150_v21 = vrot.slane %v4112_v50, 6  ;;  %v4152_v23 = vrot.slane %v4113_v20, 5  ;;  %v4154_v51 = vrot.slane %v4114_v49, 4  ;;  %p5210_p13 = scmp.ne.s32.totalorder %s6532_s14, %s5209_s23  ;;  %s5304_s18 = smov [#allocation6]  }
 0x465   : > { %v4156_v1 = vrot.slane %v4115_v57, 3  ;;  %v4158_v13 = vrot.slane %v4116_v32, 2  ;;  %v4160_v30 = vrot.slane %v4117_v2, 1  ;;  %s5213_s12 = sshll.u32 %s5304_s18, 4  ;;  %s5214_s12 = int_to_ptr.vmem [resolvable:$false] %s5213_s12 }
 0x466   : > { %v4149_v62 = vsel %vm3852_vm4, %v4148_v38, %v4110_v40  ;;  %p5211_p0 = pnand %p5210_p13, %p5403_p4  ;;  %s5215_s28 = scalar_lea.vmem %s5214_s12, 512 }
 0x467   : > { %v4151_v11 = vsel %vm3855_vm5, %v4150_v21, %v4149_v62  ;;  %p5216_p2 = scmp.lt.s32.totalorder %s6532_s14, %s5214_s12  ;;  %p5217_p3 = scmp.lt.s32.totalorder %s5215_s28, %s5209_s23 }
 0x468   : > { %v4153_v58 = vsel %vm3858_vm6, %v4152_v23, %v4151_v11  ;;  %p5212_p1 = pneg %p5211_p0 }
 0x469   : > { %v4155_v45 = vsel %vm3861_vm7, %v4154_v51, %v4153_v58  ;;  %p5218_p5 = por %p5217_p3, %p5216_p2 }
 0x46a   : > { %v4157_v56 = vsel %vm3864_vm8, %v4156_v1, %v4155_v45 }
 0x46b   : > { %v4159_v14 = vsel %vm3867_vm9, %v4158_v13, %v4157_v56  ;;  %p5219_p6 = pnand %p5218_p5, %p5212_p1 }
 0x46c   : > { %v4161_v54 = vsel %vm3870_vm10, %v4160_v30, %v4159_v14 }
 0x46d   : > { %4165 = vst.msk [vmem:[%s6466_s13 + $0x8] sm:$0xff] %vm581_vm1, %v4161_v54 }
 0x46e   : > { %5222 = shalt.err (!%p5219_p6)
}
 0x46f   : > { %s5223_s13 = scalar_lea.hbm %s6530_s29, 256  ;;  %s5227_s25 = scalar_lea.hbm %s6592_s9, 512 }
 0x470   : > { %p5224_p7 = scmp.ne.s32.totalorder %s6530_s29, %s5223_s13  ;;  %p5228_p10 = scmp.lt.s32.totalorder %s6530_s29, %s6592_s9 }
 0x471   : > { %p5229_p11 = scmp.lt.s32.totalorder %s5227_s25, %s5223_s13 }
 0x472   : > { %p5225_p9 = pnand %p5224_p7, %p5403_p4 }
 0x473   : > { %p5230_p13 = por %p5229_p11, %p5228_p10 }
 0x474   : > { %p5226_p12 = pneg %p5225_p9 }
 0x476   : > { %p5231_p0 = pnand %p5230_p13, %p5226_p12 }
 0x478   : > { %5234 = shalt.err (!%p5231_p0)
}
 0x479   : > { %5007 = dma.vmem_to_hbm [thread:$0]  (%p5403_p4), %s6532_s14, 256, %s6530_s29, %s4167_s21, %s5302_s0, %s5302_s0, %s5303_s1  }
 0x47a PF: > { %p5024_p1 = scmp.ge.s32.totalorder %s5293_s20, 2  ;;  %s4220_s23 = sand.u32 1, %s5273_s15  }
 0x47b   : > { %s4221_s12 = scalar_lea.sflag [#allocation5], %s4220_s23 }
 0x47c   : > { %p5016_p2 = pnand %p5024_p1, %p5410_p8 }
 0x47e   : > { %p5017_p3 = pneg %p5016_p2 }
 0x480   : > { %5264 = dma.done.wait (%p5017_p3), %s4221_s12, 256  }
 0x481   : > { %5266 = vsyncadd (%p5017_p3), %s4221_s12, 4294967040  ;;  %s4230_s28 = scalar_lea.sflag [#allocation8], %s4220_s23 }
 0x482   : > { %5268 = dma.done.wait (%p5017_p3), %s4230_s28, 256  }
 0x483   : > { %5270 = vsyncadd (%p5017_p3), %s4230_s28, 4294967040  ;;  %s30_s20 = sadd.s32 1, %s5293_s20   ;;  %s6630_s15 = smov %s5277_s16 }
 0x484   : > { %p27_p5 = scmp.ge.s32.totalorder %s30_s20, 4   ;;  %s6631_s16 = smov %s5281_s17 }
 0x485   : > { %s6632_s17 = smov %s5416_s27  ;;  %s6633_s18 = smov %s5289_s19 }
 0x486   : > { %s6634_s19 = smov %s6636_s22  ;;  %29 = sbr.rel (!%p27_p5) target bundleno = 10 (0xa), region = 119 }
 0x48b   :  { %4235 = vsyncpa [#allocation4], 1 }
 0x48c   :  { %4237 = vsyncpa [#allocation4 + $0x1], 1 }
 0x48d   :  { %4238 = vsyncpa [#allocation5], 1 }
 0x48e   :  { %4240 = vsyncpa [#allocation5 + $0x1], 1 }
 0x48f   :  { %4241 = vsyncpa [#allocation8], 1 }
 0x490   :  { %4243 = vsyncpa [#allocation8 + $0x1], 1 }

</bundles_post_ra>
